<compile_context>
chip_gen: v6e
topology: v6e:2x2x1
jax: 0.10.0
libtpu: 0.0.40
codegen_flags: <defaults>
</compile_context>

<pallas_src>
import jax
import jax.numpy as jnp
from jax.experimental import pallas as pl
from jax.experimental.pallas import tpu as pltpu

H1 = 1024
H2 = 512


def _round_up(x, m):
    return ((x + m - 1) // m) * m


def _cdiv(a, b):
    return -(-a // b)


def _chip_config():
    """Generation-aware defaults: (TB, TK, vmem_limit_bytes, n_tensorcores)."""
    try:
        kind = jax.devices()[0].device_kind.lower()
    except Exception:
        kind = ""
    if "v5" in kind:
        # v5e: ~240 FLOP/B balance already met at modest TB; scoped default is
        # only 16 MiB so raise it explicitly.
        return 512, 2048, 64 * 1024 * 1024, 1
    if "v6" in kind:
        # v6e: ~650 FLOP/B balance -> large TB for w1 reuse; 128 MiB VMEM.
        return 1024, 4096, 96 * 1024 * 1024, 1
    if "7" in kind:
        # v7x: only 64 MiB VMEM per TC, 2 TCs, 3.2 TB/s HBM -> TB=512 suffices.
        return 512, 4096, 48 * 1024 * 1024, 2
    # Unknown / older generation: stay conservative, let compiler pick VMEM.
    return 256, 1024, None, 1


def domain_classifier_kernel(x_ref, w1_ref, b1_ref, w2_ref, b2_ref,
                             w3_ref, b3_ref, o_ref, acc_ref):
    k = pl.program_id(1)

    @pl.when(k == 0)
    def _():
        acc_ref[...] = jnp.zeros_like(acc_ref)

    # ---- Layer 1 partial product: x streamed f32, cast to bf16 in-kernel ----
    acc_ref[...] += jnp.dot(x_ref[...].astype(jnp.bfloat16), w1_ref[...],
                            preferred_element_type=jnp.float32)

    @pl.when(k == pl.num_programs(1) - 1)
    def _():
        # ---- Finish layer 1: bias + ReLU (Dropout == identity in eval) ----
        h1 = jnp.maximum(acc_ref[...] + b1_ref[...], 0.0)

        # ---- Layer 2: Linear(1024 -> 512) + ReLU ----
        h2 = jnp.dot(h1.astype(jnp.bfloat16), w2_ref[...],
                     preferred_element_type=jnp.float32) + b2_ref[...]
        h2 = jnp.maximum(h2, 0.0)

        # ---- Layer 3: Linear(512 -> 1), contracted as (1,H2) @ (TB,H2)^T so
        # the result is produced lane-major (1, TB) -> lane-dense output store.
        z = jax.lax.dot_general(
            w3_ref[...], h2, (((1,), (1,)), ((), ())),
            preferred_element_type=jnp.float32) + b3_ref[...]

        # Exact sigmoid (epilogue is off the critical path).
        o_ref[...] = (1.0 / (1.0 + jnp.exp(-z))).reshape(1, 1, -1)


def stage_params(w1, b1, w2, b2, w3, b3, *, tk=None):
    """One-time weight staging (pad + bf16 cast), hoisted out of the forward.

    w1: [inp_size, 1024], w2: [1024, 512], w3: [512, 1] ("x @ W" layout)."""
    K = w1.shape[0]
    _, tk_default, _, _ = _chip_config()
    tk = tk or tk_default

    # K-reduction tiling: bound zero padding to < 128 columns per K tile.
    k128 = _round_up(K, 128)
    nk = max(1, _cdiv(k128, tk))
    TK = _round_up(_cdiv(k128, nk), 128)
    K_pad = nk * TK

    return dict(
        w1=jnp.pad(w1.astype(jnp.bfloat16), ((0, K_pad - K), (0, 0))),
        b1=b1.reshape(1, H1).astype(jnp.float32),
        w2=w2.astype(jnp.bfloat16),
        b2=b2.reshape(1, H2).astype(jnp.float32),
        w3=w3.reshape(1, H2).astype(jnp.float32),   # (512,1) column -> (1,512) row
        b3=b3.reshape(1, 1).astype(jnp.float32),
        K=K, TK=TK, nk=nk,
    )


def domain_classifier(x, staged, *, tb=None):
    """x: [B, inp_size] f32; staged: output of stage_params()."""
    B, K = x.shape
    assert K == staged["K"], "inp_size mismatch with staged parameters"
    TK, nk = staged["TK"], staged["nk"]
    K_pad = TK * nk

    tb_default, _, vmem_bytes, n_cores = _chip_config()
    tb = tb or tb_default

    # Batch tiling: multiple of 8 sublanes, capped at the generation default.
    TB = min(tb, _round_up(B, 8))
    B_pad = _round_up(B, TB)
    if n_cores > 1 and B_pad // TB < 2 and B >= 16:
        # Keep nb >= 2 so the "parallel" batch axis feeds both TensorCores.
        TB = _round_up(_cdiv(B, 2), 8)
        B_pad = _round_up(B, TB)
    nb = B_pad // TB

    # Pad x only when needed; it stays f32 (bf16 cast happens inside the kernel).
    if B_pad != B or K_pad != K:
        x = jnp.pad(x, ((0, B_pad - B), (0, K_pad - K)))

    cp = dict(dimension_semantics=("parallel", "arbitrary"))
    if vmem_bytes is not None:
        cp["vmem_limit_bytes"] = vmem_bytes

    out = pl.pallas_call(
        domain_classifier_kernel,
        out_shape=jax.ShapeDtypeStruct((nb, 1, TB), jnp.float32),
        grid_spec=pltpu.PrefetchScalarGridSpec(
            num_scalar_prefetch=0,
            grid=(nb, nk),
            in_specs=[
                pl.BlockSpec((TB, TK), lambda i, k: (i, k)),   # x tile (f32)
                pl.BlockSpec((TK, H1), lambda i, k: (k, 0)),   # w1 tile (bf16)
                pl.BlockSpec((1, H1), lambda i, k: (0, 0)),    # b1 (resident)
                pl.BlockSpec((H1, H2), lambda i, k: (0, 0)),   # w2 (resident)
                pl.BlockSpec((1, H2), lambda i, k: (0, 0)),    # b2 (resident)
                pl.BlockSpec((1, H2), lambda i, k: (0, 0)),    # w3 row (resident)
                pl.BlockSpec((1, 1), lambda i, k: (0, 0)),     # b3 (resident)
            ],
            out_specs=pl.BlockSpec((1, 1, TB), lambda i, k: (i, 0, 0)),
            scratch_shapes=[pltpu.VMEM((TB, H1), jnp.float32)],  # layer-1 acc
        ),
        compiler_params=pltpu.CompilerParams(**cp),
    )(x, staged["w1"], staged["b1"], staged["w2"], staged["b2"],
      staged["w3"], staged["b3"])

    return out.reshape(B_pad, 1)[:B]


def init_params(key, inp_size):
    # Deterministic synthetic init (shapes mirror the nn.Linear layers,
    # weights stored as [in_features, out_features]).
    k1, k2, k3, k4, k5, k6 = jax.random.split(key, 6)
    scale = lambda fan_in: 1.0 / jnp.sqrt(jnp.float32(fan_in))
    w1 = jax.random.uniform(k1, (inp_size, H1), jnp.float32, -1, 1) * scale(inp_size)
    b1 = jax.random.uniform(k2, (H1,), jnp.float32, -1, 1) * scale(inp_size)
    w2 = jax.random.uniform(k3, (H1, H2), jnp.float32, -1, 1) * scale(H1)
    b2 = jax.random.uniform(k4, (H2,), jnp.float32, -1, 1) * scale(H1)
    w3 = jax.random.uniform(k5, (H2, 1), jnp.float32, -1, 1) * scale(H2)
    b3 = jax.random.uniform(k6, (1,), jnp.float32, -1, 1) * scale(H2)
    return w1, b1, w2, b2, w3, b3


def reference_bf16(x, w1, b1, w2, b2, w3, b3):
    # Mirrors the kernel's bf16-operand / f32-accumulation scheme.
    h1 = jax.nn.relu(
        jnp.dot(x.astype(jnp.bfloat16), w1.astype(jnp.bfloat16),
                preferred_element_type=jnp.float32) + b1[None, :])
    h2 = jax.nn.relu(
        jnp.dot(h1.astype(jnp.bfloat16), w2.astype(jnp.bfloat16),
                preferred_element_type=jnp.float32) + b2[None, :])
    z = jnp.sum(h2 * w3.reshape(1, -1), axis=-1, keepdims=True) + b3.reshape(1, 1)
    return jax.nn.sigmoid(z)


def reference_f32(x, w1, b1, w2, b2, w3, b3):
    # True f32 forward (PyTorch eval-mode numerics, up to summation order).
    hi = jax.lax.Precision.HIGHEST
    h1 = jax.nn.relu(jnp.dot(x, w1, precision=hi) + b1[None, :])
    h2 = jax.nn.relu(jnp.dot(h1, w2, precision=hi) + b2[None, :])
    z = jnp.dot(h2, w3, precision=hi) + b3[None, :]
    return jax.nn.sigmoid(z)


if __name__ == "__main__":
    key = jax.random.PRNGKey(0)
    k_x, k_p = jax.random.split(key)

    B, inp_size = 8, 32
    x = jax.random.normal(k_x, (B, inp_size), jnp.float32)
    params = init_params(k_p, inp_size)

    staged = stage_params(*params)          # one-time weight staging (hoisted)
    out = domain_classifier(x, staged)
    out = jax.block_until_ready(out)

    assert out.shape == (B, 1)

    ref = reference_bf16(x, *params)        # same numerics as the kernel
    err = float(jnp.max(jnp.abs(out - ref)))
    assert jnp.allclose(out, ref, atol=5e-3, rtol=5e-3), err

    ref32 = reference_f32(x, *params)       # document bf16 drift vs true f32
    err32 = float(jnp.max(jnp.abs(out - ref32)))
    assert jnp.allclose(out, ref32, atol=2e-2, rtol=2e-2), err32

    print("KERNEL_OK")
</pallas_src>

<mosaic_0001>
module attributes {stable_mosaic.version = 11 : i64} {
  func.func @domain_classifier_kernel(%arg0: i32, %arg1: i32, %arg2: memref<8x128xf32, #tpu.memory_space<vmem>>, %arg3: memref<128x1024xbf16, #tpu.memory_space<vmem>>, %arg4: memref<1x1024xf32, #tpu.memory_space<vmem>>, %arg5: memref<1024x512xbf16, #tpu.memory_space<vmem>>, %arg6: memref<1x512xf32, #tpu.memory_space<vmem>>, %arg7: memref<1x512xf32, #tpu.memory_space<vmem>>, %arg8: memref<1x1xf32, #tpu.memory_space<vmem>>, %arg9: memref<1x1x8xf32, #tpu.memory_space<vmem>>, %arg10: memref<8x1024xf32, #tpu.memory_space<vmem>>) attributes {dimension_semantics = [#tpu.dimension_semantics<parallel>, #tpu.dimension_semantics<arbitrary>], iteration_bounds = array<i64: 1, 1>, scalar_prefetch = 0 : i64, scratch_operands = 1 : i64, tpu.core_type = #tpu.core_type<tc>, window_params = [{transform_indices = @transform_0, window_bounds = array<i64: 8, 128>}, {transform_indices = @transform_1, window_bounds = array<i64: 128, 1024>}, {pipeline_mode = #tpu.pipeline_mode<synchronous>, transform_indices = @transform_2, window_bounds = array<i64: 1, 1024>}, {pipeline_mode = #tpu.pipeline_mode<synchronous>, transform_indices = @transform_3, window_bounds = array<i64: 1024, 512>}, {pipeline_mode = #tpu.pipeline_mode<synchronous>, transform_indices = @transform_4, window_bounds = array<i64: 1, 512>}, {pipeline_mode = #tpu.pipeline_mode<synchronous>, transform_indices = @transform_5, window_bounds = array<i64: 1, 512>}, {pipeline_mode = #tpu.pipeline_mode<synchronous>, transform_indices = @transform_6, window_bounds = array<i64: 1, 1>}, {transform_indices = @transform_7, window_bounds = array<i64: 1, 1, 8>}]} {
    %c0_i32 = arith.constant 0 : i32
    %0 = arith.cmpi eq, %arg1, %c0_i32 : i32
    %1 = arith.extui %0 : i1 to i32
    %c0_i32_0 = arith.constant 0 : i32
    %2 = arith.cmpi ne, %1, %c0_i32_0 : i32
    scf.if %2 {
      %cst_10 = arith.constant 0.000000e+00 : f32
      %13 = vector.broadcast %cst_10 : f32 to vector<8x1024xf32>
      %c0_11 = arith.constant 0 : index
      %c0_12 = arith.constant 0 : index
      %14 = vector.load %arg10[%c0_11, %c0_12] : memref<8x1024xf32, #tpu.memory_space<vmem>>, vector<8x1024xf32>
      tpu.vector_store %arg10[%c0_11, %c0_12], %13 {strides = array<i32>} : memref<8x1024xf32, #tpu.memory_space<vmem>>, vector<8x1024xf32>,
    } else {
    }
    %c0 = arith.constant 0 : index
    %c0_1 = arith.constant 0 : index
    %3 = vector.load %arg10[%c0, %c0_1] : memref<8x1024xf32, #tpu.memory_space<vmem>>, vector<8x1024xf32>
    %c0_2 = arith.constant 0 : index
    %c0_3 = arith.constant 0 : index
    %4 = vector.load %arg2[%c0_2, %c0_3] : memref<8x128xf32, #tpu.memory_space<vmem>>, vector<8x128xf32>
    %5 = arith.truncf %4 : vector<8x128xf32> to vector<8x128xbf16>
    %c0_4 = arith.constant 0 : index
    %c0_5 = arith.constant 0 : index
    %6 = vector.load %arg3[%c0_4, %c0_5] : memref<128x1024xbf16, #tpu.memory_space<vmem>>, vector<128x1024xbf16>
    %cst = arith.constant dense<0.000000e+00> : vector<8x1024xf32>
    %7 = tpu.matmul %5, %6, %cst {dimension_numbers = #tpu.dot_dimension_numbers<[1], [0], [0], [1], [0, 0, 1, 1], [], []>} : vector<8x128xbf16>, vector<128x1024xbf16>, vector<8x1024xf32> -> vector<8x1024xf32>
    %8 = arith.addf %3, %7 : vector<8x1024xf32>
    %c0_6 = arith.constant 0 : index
    %c0_7 = arith.constant 0 : index
    %9 = vector.load %arg10[%c0_6, %c0_7] : memref<8x1024xf32, #tpu.memory_space<vmem>>, vector<8x1024xf32>
    tpu.vector_store %arg10[%c0_6, %c0_7], %8 {strides = array<i32>} : memref<8x1024xf32, #tpu.memory_space<vmem>>, vector<8x1024xf32>,
    %c0_i32_8 = arith.constant 0 : i32
    %10 = arith.cmpi eq, %arg1, %c0_i32_8 : i32
    %11 = arith.extui %10 : i1 to i32
    %c0_i32_9 = arith.constant 0 : i32
    %12 = arith.cmpi ne, %11, %c0_i32_9 : i32
    scf.if %12 {
      %c0_10 = arith.constant 0 : index
      %c0_11 = arith.constant 0 : index
      %13 = vector.load %arg10[%c0_10, %c0_11] : memref<8x1024xf32, #tpu.memory_space<vmem>>, vector<8x1024xf32>
      %c0_12 = arith.constant 0 : index
      %c0_13 = arith.constant 0 : index
      %14 = vector.load %arg4[%c0_12, %c0_13] : memref<1x1024xf32, #tpu.memory_space<vmem>>, vector<1x1024xf32>
      %15 = vector.broadcast %14 : vector<1x1024xf32> to vector<8x1024xf32>
      %16 = arith.addf %13, %15 : vector<8x1024xf32>
      %cst_14 = arith.constant 0.000000e+00 : f32
      %17 = vector.broadcast %cst_14 : f32 to vector<8x1024xf32>
      %18 = arith.maximumf %16, %17 : vector<8x1024xf32>
      %19 = arith.truncf %18 : vector<8x1024xf32> to vector<8x1024xbf16>
      %c0_15 = arith.constant 0 : index
      %c0_16 = arith.constant 0 : index
      %20 = vector.load %arg5[%c0_15, %c0_16] : memref<1024x512xbf16, #tpu.memory_space<vmem>>, vector<1024x512xbf16>
      %cst_17 = arith.constant dense<0.000000e+00> : vector<8x512xf32>
      %21 = tpu.matmul %19, %20, %cst_17 {dimension_numbers = #tpu.dot_dimension_numbers<[1], [0], [0], [1], [0, 0, 1, 1], [], []>} : vector<8x1024xbf16>, vector<1024x512xbf16>, vector<8x512xf32> -> vector<8x512xf32>
      %c0_18 = arith.constant 0 : index
      %c0_19 = arith.constant 0 : index
      %22 = vector.load %arg6[%c0_18, %c0_19] : memref<1x512xf32, #tpu.memory_space<vmem>>, vector<1x512xf32>
      %23 = vector.broadcast %22 : vector<1x512xf32> to vector<8x512xf32>
      %24 = arith.addf %21, %23 : vector<8x512xf32>
      %cst_20 = arith.constant 0.000000e+00 : f32
      %25 = vector.broadcast %cst_20 : f32 to vector<8x512xf32>
      %26 = arith.maximumf %24, %25 : vector<8x512xf32>
      %c0_21 = arith.constant 0 : index
      %c0_22 = arith.constant 0 : index
      %27 = vector.load %arg7[%c0_21, %c0_22] : memref<1x512xf32, #tpu.memory_space<vmem>>, vector<1x512xf32>
      %cst_23 = arith.constant dense<0.000000e+00> : vector<1x8xf32>
      %28 = tpu.matmul %27, %26, %cst_23 {dimension_numbers = #tpu.dot_dimension_numbers<[1], [1], [0], [0], [0, 0, 1, 0], [], []>} : vector<1x512xf32>, vector<8x512xf32>, vector<1x8xf32> -> vector<1x8xf32>
      %c0_24 = arith.constant 0 : index
      %c0_25 = arith.constant 0 : index
      %29 = vector.load %arg8[%c0_24, %c0_25] : memref<1x1xf32, #tpu.memory_space<vmem>>, vector<1x1xf32>
      %30 = vector.broadcast %29 : vector<1x1xf32> to vector<1x8xf32>
      %31 = arith.addf %28, %30 : vector<1x8xf32>
      %cst_26 = arith.constant 0.000000e+00 : f32
      %32 = vector.broadcast %cst_26 : f32 to vector<1x8xf32>
      %33 = arith.subf %32, %31 : vector<1x8xf32>
      %34 = math.exp %33 : vector<1x8xf32>
      %cst_27 = arith.constant 1.000000e+00 : f32
      %35 = vector.broadcast %cst_27 : f32 to vector<1x8xf32>
      %36 = arith.addf %35, %34 : vector<1x8xf32>
      %cst_28 = arith.constant 1.000000e+00 : f32
      %37 = vector.broadcast %cst_28 : f32 to vector<1x8xf32>
      %38 = arith.divf %37, %36 : vector<1x8xf32>
      %39 = vector.shape_cast %38 : vector<1x8xf32> to vector<1x1x8xf32>
      %c0_29 = arith.constant 0 : index
      %c0_30 = arith.constant 0 : index
      %c0_31 = arith.constant 0 : index
      %40 = vector.load %arg9[%c0_29, %c0_30, %c0_31] : memref<1x1x8xf32, #tpu.memory_space<vmem>>, vector<1x1x8xf32>
      tpu.vector_store %arg9[%c0_29, %c0_30, %c0_31], %39 {strides = array<i32>} : memref<1x1x8xf32, #tpu.memory_space<vmem>>, vector<1x1x8xf32>,
    } else {
    }
    return
  }
  func.func @transform_0(%arg0: i32, %arg1: i32) -> (i32, i32) {
    %c0_i32 = arith.constant 0 : i32
    return %arg0, %arg1 : i32, i32
  }
  func.func @transform_1(%arg0: i32, %arg1: i32) -> (i32, i32) {
    %c0_i32 = arith.constant 0 : i32
    %c0_i32_0 = arith.constant 0 : i32
    return %arg1, %c0_i32 : i32, i32
  }
  func.func @transform_2(%arg0: i32, %arg1: i32) -> (i32, i32) {
    %c0_i32 = arith.constant 0 : i32
    %c0_i32_0 = arith.constant 0 : i32
    %c0_i32_1 = arith.constant 0 : i32
    return %c0_i32, %c0_i32_0 : i32, i32
  }
  func.func @transform_3(%arg0: i32, %arg1: i32) -> (i32, i32) {
    %c0_i32 = arith.constant 0 : i32
    %c0_i32_0 = arith.constant 0 : i32
    %c0_i32_1 = arith.constant 0 : i32
    return %c0_i32, %c0_i32_0 : i32, i32
  }
  func.func @transform_4(%arg0: i32, %arg1: i32) -> (i32, i32) {
    %c0_i32 = arith.constant 0 : i32
    %c0_i32_0 = arith.constant 0 : i32
    %c0_i32_1 = arith.constant 0 : i32
    return %c0_i32, %c0_i32_0 : i32, i32
  }
  func.func @transform_5(%arg0: i32, %arg1: i32) -> (i32, i32) {
    %c0_i32 = arith.constant 0 : i32
    %c0_i32_0 = arith.constant 0 : i32
    %c0_i32_1 = arith.constant 0 : i32
    return %c0_i32, %c0_i32_0 : i32, i32
  }
  func.func @transform_6(%arg0: i32, %arg1: i32) -> (i32, i32) {
    %c0_i32 = arith.constant 0 : i32
    %c0_i32_0 = arith.constant 0 : i32
    %c0_i32_1 = arith.constant 0 : i32
    return %c0_i32, %c0_i32_0 : i32, i32
  }
  func.func @transform_7(%arg0: i32, %arg1: i32) -> (i32, i32, i32) {
    %c0_i32 = arith.constant 0 : i32
    %c0_i32_0 = arith.constant 0 : i32
    %c0_i32_1 = arith.constant 0 : i32
    return %arg0, %c0_i32, %c0_i32_0 : i32, i32, i32
  }
}

</mosaic_0001>

<bundles_post_ra>
// kernel: tpu_custom_call.1
= control target key start
LH: loop header
LB: loop body
LE: loop exit
PB: predicated region body
PF: predicated region fallthrough
CT: control target
= control target key end

     0   :  { %s3828_s0 = inlined_call_operand.hbm [shape: f32[8,128], index: 0, kind: input, shape index: {}]   ;;  %s3829_s1 = inlined_call_operand.hbm [shape: bf16[128,1024], index: 1, kind: input, shape index: {}]   ;;  %s3830_s2 = inlined_call_operand.hbm [shape: f32[1,1024], index: 2, kind: input, shape index: {}]   ;;  %s3831_s3 = inlined_call_operand.hbm [shape: bf16[1024,512], index: 3, kind: input, shape index: {}]   ;;  %s3832_s4 = inlined_call_operand.vmem [shape: f32[1,512], index: 4, kind: input, shape index: {}]   ;;  %s3833_s5 = inlined_call_operand.vmem [shape: f32[1,512], index: 5, kind: input, shape index: {}]   ;;  %s3834_s6 = inlined_call_operand.<no memory space> [shape: f32[1,1], index: 6, kind: input, shape index: {}]   ;;  %s3835_s7 = inlined_call_operand.hbm [shape: f32[1,1,8], index: 7, kind: output, shape index: {}]  }
   0x1   :  { %v12_v0 = vstv %s3834_s6 }
   0x2   :  { %13 = vst [vmem:[#allocation3] sm:$0x1] %v12_v0 }
   0x3   :  { %14 = vsyncpa [#allocation5], 0 }
   0x4   :  { %15 = vsyncpa [#allocation8], 0 }
   0x5   :  { %16 = vsyncpa [#allocation11], 0 }
   0x6   :  { %17 = vsyncpa [#allocation6], 0  ;;  %s3658_s26 = smov [#allocation7]  }
   0x7   :  { %s33_s27 = sshll.u32 %s3658_s26, 4  ;;  %s34_s27 = int_to_ptr.vmem [resolvable:$true] %s33_s27 }
   0x8   :  { %s3558_s28 = scalar_lea.vmem %s34_s27, 8192  ;;  %p3563_p1 = scmp.lt.s32.totalorder %s34_s27, %s34_s27 }
   0x9   :  { %p3559_p0 = scmp.ne.s32.totalorder %s34_s27, %s3558_s28  ;;  %p3564_p2 = scmp.lt.s32.totalorder %s3558_s28, %s3558_s28 }
   0xb   :  { %p3565_p3 = por %p3564_p2, %p3563_p1 }
   0xd   :  { %p3566_p4 = pnand %p3565_p3, %p3559_p0 }
   0xf   :  { %3569 = shalt.err (!%p3566_p4)
}
  0x10   :  { %s3659_s29 = smov 512   ;;  %s3660_s30 = smov 32  }
  0x11   :  { %39 = dma.hbm_to_vmem [thread:$0]  %s3829_s1, 8192, %s34_s27, [#allocation8], %s3659_s29, %s3659_s29, %s3660_s30  }
  0x12   :  { %s3661_s6 = smov [#allocation4]   ;;  %s3662_s11 = smov [#allocation9]  }
  0x13   :  { %s24_s10 = sshll.u32 %s3661_s6, 4  ;;  %s46_s12 = sshll.u32 %s3662_s11, 4  ;;  %s25_s10 = int_to_ptr.vmem [resolvable:$true] %s24_s10  ;;  %s47_s12 = int_to_ptr.vmem [resolvable:$true] %s46_s12 }
  0x14   :  { %s3578_s13 = scalar_lea.vmem %s25_s10, 128  ;;  %p3583_p6 = scmp.lt.s32.totalorder %s25_s10, %s25_s10 }
  0x15   :  { %p3579_p5 = scmp.ne.s32.totalorder %s25_s10, %s3578_s13  ;;  %p3584_p7 = scmp.lt.s32.totalorder %s3578_s13, %s3578_s13 }
  0x17   :  { %p3585_p8 = por %p3584_p7, %p3583_p6 }
  0x19   :  { %p3586_p9 = pnand %p3585_p8, %p3579_p5 }
  0x1b   :  { %3589 = shalt.err (!%p3586_p9)
}
  0x1c   :  { %27 = dma.hbm_to_vmem [thread:$0]  %s3828_s0, 128, %s25_s10, [#allocation5]  }
  0x1d   :  { %s3598_s16 = scalar_lea.vmem %s47_s12, 128  ;;  %p3603_p11 = scmp.lt.s32.totalorder %s47_s12, %s47_s12 }
  0x1e   :  { %p3599_p10 = scmp.ne.s32.totalorder %s47_s12, %s3598_s16  ;;  %p3604_p12 = scmp.lt.s32.totalorder %s3598_s16, %s3598_s16 }
  0x20   :  { %p3605_p13 = por %p3604_p12, %p3603_p11 }
  0x22   :  { %p3606_p0 = pnand %p3605_p13, %p3599_p10 }
  0x24   :  { %3609 = shalt.err (!%p3606_p0)
}
  0x25   :  { %49 = dma.hbm_to_vmem [thread:$0]  %s3830_s2, 128, %s47_s12, [#allocation8]  }
  0x26   :  { %s3663_s18 = smov [#allocation10]  }
  0x27   :  { %s55_s19 = sshll.u32 %s3663_s18, 4  ;;  %s56_s19 = int_to_ptr.vmem [resolvable:$true] %s55_s19 }
  0x28   :  { %s3618_s20 = scalar_lea.vmem %s56_s19, 32768  ;;  %p3623_p2 = scmp.lt.s32.totalorder %s56_s19, %s56_s19 }
  0x29   :  { %p3619_p1 = scmp.ne.s32.totalorder %s56_s19, %s3618_s20  ;;  %p3624_p3 = scmp.lt.s32.totalorder %s3618_s20, %s3618_s20 }
  0x2b   :  { %p3625_p4 = por %p3624_p3, %p3623_p2 }
  0x2d   :  { %p3626_p5 = pnand %p3625_p4, %p3619_p1 }
  0x2f   :  { %3629 = shalt.err (!%p3626_p5)
}
  0x30   :  { %s3664_s0 = smov 256   ;;  %s3665_s21 = smov 16  }
  0x31   :  { %61 = dma.hbm_to_vmem [thread:$0]  %s3831_s3, 32768, %s56_s19, [#allocation11], %s3664_s0, %s3664_s0, %s3665_s21  }
  0x32   :  { %3650 = dma.done.wait [#allocation5], 128  }
  0x33   :  { %3651 = vsyncadd [#allocation5], 4294967168 }
  0x34   :  { %3652 = dma.done.wait [#allocation8], 8320  }
  0x35   :  { %3653 = vsyncadd [#allocation8], 4294958976 }
  0x36   :  { %3654 = dma.done.wait [#allocation11], 32768  }
  0x37   :  { %3655 = vsyncadd [#allocation11], 4294934528  ;;  %v3666_v1 = vmov 0   ;;  %v159_v2 = vld [vmem:[#allocation7 + $0x1c0] sm:$0xff]  ;;  %v160_v4 = vld [vmem:[#allocation7 + $0x1c8] sm:$0xff]  ;;  %vm2812_vm0 = vcmask 57344  }
  0x38   :  { %519 = vmatprep.mubr.bf16.mxu0 %v3666_v1  ;;  %560 = vmatprep.mubr.bf16.mxu1 %v3666_v1  ;;  %v163_v3 = vld [vmem:[#allocation7 + $0x1e0] sm:$0xff]  ;;  %v164_v6 = vld [vmem:[#allocation7 + $0x1e8] sm:$0xff]  ;;  %v161_v63 = vld [vmem:[#allocation7 + $0x1d0] sm:$0xff] }
  0x39   :  { %3161 = vset.pattern.permute.xlu0 %v3666_v1  ;;  %v2888_v5 = vcombine.high %v159_v2, %v163_v3  ;;  %v2887_v7 = vcombine.low %v159_v2, %v163_v3  ;;  %v151_v8 = vld [vmem:[#allocation7 + $0x180] sm:$0xff]  ;;  %v2890_v10 = vcombine.high %v160_v4, %v164_v6  ;;  %v2889_v11 = vcombine.low %v160_v4, %v164_v6  ;;  %v152_v13 = vld [vmem:[#allocation7 + $0x188] sm:$0xff]  ;;  %v165_v2 = vld [vmem:[#allocation7 + $0x1f0] sm:$0xff] }
  0x3a   :  { %v155_v9 = vld [vmem:[#allocation7 + $0x1a0] sm:$0xff]  ;;  %v156_v14 = vld [vmem:[#allocation7 + $0x1a8] sm:$0xff]  ;;  %v162_v3 = vld [vmem:[#allocation7 + $0x1d8] sm:$0xff] }
  0x3b   :  { %v2880_v12 = vcombine.high %v151_v8, %v155_v9  ;;  %v143_v15 = vld [vmem:[#allocation7 + $0x140] sm:$0xff]  ;;  %487 = vmatprep.subr.bf16.mxu0 %v2888_v5  ;;  %v2882_v16 = vcombine.high %v152_v13, %v156_v14  ;;  %v144_v18 = vld [vmem:[#allocation7 + $0x148] sm:$0xff]  ;;  %528 = vmatprep.subr.bf16.mxu1 %v2890_v10  ;;  %v2879_v20 = vcombine.low %v151_v8, %v155_v9  ;;  %v166_v4 = vld [vmem:[#allocation7 + $0x1f8] sm:$0xff] }
  0x3c   :  { %v147_v17 = vld [vmem:[#allocation7 + $0x160] sm:$0xff]  ;;  %v148_v19 = vld [vmem:[#allocation7 + $0x168] sm:$0xff]  ;;  %488 = vmatpush1.bf16.msra.mxu0 %v2887_v7  ;;  %529 = vmatpush1.bf16.msra.mxu1 %v2889_v11  ;;  %v2881_v21 = vcombine.low %v152_v13, %v156_v14  ;;  %v101_v6 = vld [vmem:[#allocation4] sm:$0xff]  ;;  %v2892_v8 = vcombine.high %v161_v63, %v165_v2  ;;  %v2894_v10 = vcombine.high %v162_v3, %v166_v4 }
  0x3d   :  { %489 = vmatprep.subr.bf16.mxu0 %v2880_v12  ;;  %v2872_v22 = vcombine.high %v143_v15, %v147_v17  ;;  %530 = vmatprep.subr.bf16.mxu1 %v2882_v16  ;;  %v2874_v23 = vcombine.high %v144_v18, %v148_v19  ;;  %v135_v24 = vld [vmem:[#allocation7 + $0x100] sm:$0xff]  ;;  %v136_v26 = vld [vmem:[#allocation7 + $0x108] sm:$0xff]  ;;  %v2871_v28 = vcombine.low %v143_v15, %v147_v17  ;;  %v153_v9 = vld [vmem:[#allocation7 + $0x190] sm:$0xff] }
  0x3e   :  { %v139_v25 = vld [vmem:[#allocation7 + $0x120] sm:$0xff]  ;;  %v140_v27 = vld [vmem:[#allocation7 + $0x128] sm:$0xff]  ;;  %v2873_v29 = vcombine.low %v144_v18, %v148_v19  ;;  %v157_v11 = vld [vmem:[#allocation7 + $0x1b0] sm:$0xff]  ;;  %v3726_v13 = vpack.c.bf16 %v101_v6, %v101_v6  ;;  %v2891_v15 = vcombine.low %v161_v63, %v165_v2  ;;  %v2893_v16 = vcombine.low %v162_v3, %v166_v4 }
  0x3f   :  { %v2864_v30 = vcombine.high %v135_v24, %v139_v25  ;;  %v2866_v31 = vcombine.high %v136_v26, %v140_v27  ;;  %v127_v32 = vld [vmem:[#allocation7 + $0xc0] sm:$0xff]  ;;  %v128_v34 = vld [vmem:[#allocation7 + $0xc8] sm:$0xff]  ;;  %v2863_v36 = vcombine.low %v135_v24, %v139_v25  ;;  %v2865_v37 = vcombine.low %v136_v26, %v140_v27  ;;  %v154_v12 = vld [vmem:[#allocation7 + $0x198] sm:$0xff] }
  0x40   :  { %490 = vmatpush1.bf16.msra.mxu0 %v2879_v20  ;;  %531 = vmatpush1.bf16.msra.mxu1 %v2881_v21  ;;  %v131_v33 = vld [vmem:[#allocation7 + $0xe0] sm:$0xff]  ;;  %v132_v35 = vld [vmem:[#allocation7 + $0xe8] sm:$0xff]  ;;  %v158_v14 = vld [vmem:[#allocation7 + $0x1b8] sm:$0xff]  ;;  %v2884_v17 = vcombine.high %v153_v9, %v157_v11 }
  0x41   :  { %491 = vmatprep.subr.bf16.mxu0 %v2872_v22  ;;  %532 = vmatprep.subr.bf16.mxu1 %v2874_v23  ;;  %v2856_v38 = vcombine.high %v127_v32, %v131_v33  ;;  %v2858_v39 = vcombine.high %v128_v34, %v132_v35  ;;  %v119_v40 = vld [vmem:[#allocation7 + $0x80] sm:$0xff]  ;;  %v120_v42 = vld [vmem:[#allocation7 + $0x88] sm:$0xff]  ;;  %v2855_v44 = vcombine.low %v127_v32, %v131_v33  ;;  %v145_v18 = vld [vmem:[#allocation7 + $0x150] sm:$0xff] }
  0x42   :  { %v123_v41 = vld [vmem:[#allocation7 + $0xa0] sm:$0xff]  ;;  %v124_v43 = vld [vmem:[#allocation7 + $0xa8] sm:$0xff]  ;;  %v2857_v45 = vcombine.low %v128_v34, %v132_v35  ;;  %v2886_v19 = vcombine.high %v154_v12, %v158_v14  ;;  %v149_v20 = vld [vmem:[#allocation7 + $0x170] sm:$0xff]  ;;  %v2883_v23 = vcombine.low %v153_v9, %v157_v11  ;;  %v2885_v24 = vcombine.low %v154_v12, %v158_v14 }
  0x43   :  { %v2848_v46 = vcombine.high %v119_v40, %v123_v41  ;;  %v2850_v47 = vcombine.high %v120_v42, %v124_v43  ;;  %v111_v48 = vld [vmem:[#allocation7 + $0x40] sm:$0xff]  ;;  %v112_v50 = vld [vmem:[#allocation7 + $0x48] sm:$0xff]  ;;  %v2847_v52 = vcombine.low %v119_v40, %v123_v41  ;;  %v2849_v53 = vcombine.low %v120_v42, %v124_v43  ;;  %v146_v21 = vld [vmem:[#allocation7 + $0x158] sm:$0xff] }
  0x44   :  { %492 = vmatpush1.bf16.msra.mxu0 %v2871_v28  ;;  %533 = vmatpush1.bf16.msra.mxu1 %v2873_v29  ;;  %v115_v49 = vld [vmem:[#allocation7 + $0x60] sm:$0xff]  ;;  %v116_v51 = vld [vmem:[#allocation7 + $0x68] sm:$0xff]  ;;  %v150_v22 = vld [vmem:[#allocation7 + $0x178] sm:$0xff]  ;;  %v2876_v25 = vcombine.high %v145_v18, %v149_v20 }
  0x45   :  { %493 = vmatprep.subr.bf16.mxu0 %v2864_v30  ;;  %534 = vmatprep.subr.bf16.mxu1 %v2866_v31  ;;  %v2840_v54 = vcombine.high %v111_v48, %v115_v49  ;;  %v103_v55 = vld [vmem:[#allocation7] sm:$0xff]  ;;  %v2842_v56 = vcombine.high %v112_v50, %v116_v51  ;;  %v104_v58 = vld [vmem:[#allocation7 + $0x8] sm:$0xff]  ;;  %v2839_v60 = vcombine.low %v111_v48, %v115_v49  ;;  %v137_v26 = vld [vmem:[#allocation7 + $0x110] sm:$0xff] }
  0x46   :  { %v107_v57 = vld [vmem:[#allocation7 + $0x20] sm:$0xff]  ;;  %v108_v59 = vld [vmem:[#allocation7 + $0x28] sm:$0xff]  ;;  %v2841_v61 = vcombine.low %v112_v50, %v116_v51  ;;  %v2878_v27 = vcombine.high %v146_v21, %v150_v22  ;;  %v141_v28 = vld [vmem:[#allocation7 + $0x130] sm:$0xff]  ;;  %v2875_v31 = vcombine.low %v145_v18, %v149_v20  ;;  %v2877_v32 = vcombine.low %v146_v21, %v150_v22 }
  0x47   :  { %v2832_v62 = vcombine.high %v103_v55, %v107_v57  ;;  %v2834_v0 = vcombine.high %v104_v58, %v108_v59  ;;  %v2831_v5 = vcombine.low %v103_v55, %v107_v57  ;;  %v2833_v7 = vcombine.low %v104_v58, %v108_v59  ;;  %v138_v29 = vld [vmem:[#allocation7 + $0x118] sm:$0xff]  ;;  %v129_v34 = vld [vmem:[#allocation7 + $0xd0] sm:$0xff] }
  0x48   :  { %494 = vmatpush1.bf16.msra.mxu0 %v2863_v36  ;;  %535 = vmatpush1.bf16.msra.mxu1 %v2865_v37  ;;  %v142_v30 = vld [vmem:[#allocation7 + $0x138] sm:$0xff]  ;;  %v2868_v33 = vcombine.high %v137_v26, %v141_v28  ;;  %v133_v36 = vld [vmem:[#allocation7 + $0xf0] sm:$0xff] }
  0x49   :  { %495 = vmatprep.subr.bf16.mxu0 %v2856_v38  ;;  %536 = vmatprep.subr.bf16.mxu1 %v2858_v39  ;;  %v2870_v35 = vcombine.high %v138_v29, %v142_v30  ;;  %v130_v37 = vld [vmem:[#allocation7 + $0xd8] sm:$0xff]  ;;  %v2867_v39 = vcombine.low %v137_v26, %v141_v28  ;;  %v2869_v40 = vcombine.low %v138_v29, %v142_v30  ;;  %v121_v42 = vld [vmem:[#allocation7 + $0x90] sm:$0xff] }
  0x4a   :  { %v134_v38 = vld [vmem:[#allocation7 + $0xf8] sm:$0xff]  ;;  %v2860_v41 = vcombine.high %v129_v34, %v133_v36  ;;  %v125_v43 = vld [vmem:[#allocation7 + $0xb0] sm:$0xff] }
  0x4b   :  { %v2852_v48 = vcombine.high %v121_v42, %v125_v43  ;;  %v113_v49 = vld [vmem:[#allocation7 + $0x50] sm:$0xff]  ;;  %v3164_v3 = vld [vmem:[#allocation10 + $0xe4] ss:$16 sps:$4 sm:$0xff]   ;;  %v3168_v11 = vld [vmem:[#allocation10 + $0xc0] ss:$16 sps:$4 sm:$0xff]  }
  0x4c   :  { %496 = vmatpush1.bf16.msra.mxu0 %v2855_v44  ;;  %537 = vmatpush1.bf16.msra.mxu1 %v2857_v45  ;;  %v122_v44 = vld [vmem:[#allocation7 + $0x98] sm:$0xff]  ;;  %v117_v51 = vld [vmem:[#allocation7 + $0x70] sm:$0xff] }
  0x4d   :  { %497 = vmatprep.subr.bf16.mxu0 %v2848_v46  ;;  %538 = vmatprep.subr.bf16.mxu1 %v2850_v47  ;;  %v126_v45 = vld [vmem:[#allocation7 + $0xb8] sm:$0xff]  ;;  %v2859_v46 = vcombine.low %v129_v34, %v133_v36  ;;  %v2861_v47 = vcombine.low %v130_v37, %v134_v38  ;;  %v105_v57 = vld [vmem:[#allocation7 + $0x10] sm:$0xff] }
  0x4e   :  { %v2854_v50 = vcombine.high %v122_v44, %v126_v45  ;;  %v2853_v55 = vcombine.low %v122_v44, %v126_v45  ;;  %v109_v59 = vld [vmem:[#allocation7 + $0x30] sm:$0xff]  ;;  %v3170_v9 = vld [vmem:[#allocation10 + $0xc4] ss:$16 sps:$4 sm:$0xff]   ;;  %v3171_v12 = vld [vmem:[#allocation10 + $0x2c0] ss:$16 sps:$4 sm:$0xff]  }
  0x4f   :  { %v2835_v4 = vcombine.low %v105_v57, %v109_v59  ;;  %v3176_v14 = vld [vmem:[#allocation10 + $0xa4] ss:$16 sps:$4 sm:$0xff]   ;;  %v3180_v20 = vld [vmem:[#allocation10 + $0x80] ss:$16 sps:$4 sm:$0xff]  }
  0x50   :  { %498 = vmatpush1.bf16.msra.mxu0 %v2847_v52  ;;  %539 = vmatpush1.bf16.msra.mxu1 %v2849_v53  ;;  %v114_v52 = vld [vmem:[#allocation7 + $0x58] sm:$0xff] }
  0x51   :  { %499 = vmatprep.subr.bf16.mxu0 %v2840_v54  ;;  %540 = vmatprep.subr.bf16.mxu1 %v2842_v56  ;;  %v118_v53 = vld [vmem:[#allocation7 + $0x78] sm:$0xff]  ;;  %v2851_v54 = vcombine.low %v121_v42, %v125_v43  ;;  %v2844_v56 = vcombine.high %v113_v49, %v117_v51 }
  0x52   :  { %v2846_v58 = vcombine.high %v114_v52, %v118_v53  ;;  %v2845_v63 = vcombine.low %v114_v52, %v118_v53  ;;  %v3182_v18 = vld [vmem:[#allocation10 + $0x84] ss:$16 sps:$4 sm:$0xff]   ;;  %v3183_v21 = vld [vmem:[#allocation10 + $0x280] ss:$16 sps:$4 sm:$0xff]  }
  0x53   :  { %v3188_v22 = vld [vmem:[#allocation10 + $0x64] ss:$16 sps:$4 sm:$0xff]   ;;  %v3195_v28 = vld [vmem:[#allocation10 + $0x240] ss:$16 sps:$4 sm:$0xff]  }
  0x54   :  { %500 = vmatpush1.bf16.msra.mxu0 %v2839_v60  ;;  %541 = vmatpush1.bf16.msra.mxu1 %v2841_v61  ;;  %v106_v60 = vld [vmem:[#allocation7 + $0x18] sm:$0xff] }
  0x55   :  { %501 = vmatprep.subr.bf16.mxu0 %v2832_v62  ;;  %542 = vmatprep.subr.bf16.mxu1 %v2834_v0  ;;  %v110_v61 = vld [vmem:[#allocation7 + $0x38] sm:$0xff]  ;;  %v2843_v62 = vcombine.low %v113_v49, %v117_v51  ;;  %v2836_v0 = vcombine.high %v105_v57, %v109_v59 }
  0x56   :  { %v2838_v2 = vcombine.high %v106_v60, %v110_v61  ;;  %v2837_v6 = vcombine.low %v106_v60, %v110_v61  ;;  %v3197_v26 = vld [vmem:[#allocation10 + $0x244] ss:$16 sps:$4 sm:$0xff]   ;;  %v3207_v36 = vld [vmem:[#allocation10 + $0x200] ss:$16 sps:$4 sm:$0xff]  }
  0x57   :  { %v3200_v29 = vld [vmem:[#allocation10 + $0x24] ss:$16 sps:$4 sm:$0xff]   ;;  %v3219_v43 = vld [vmem:[#allocation10 + $0x3c0] ss:$16 sps:$4 sm:$0xff]  }
  0x58   :  { %502 = vmatpush1.bf16.msra.mxu0 %v2831_v5  ;;  %543 = vmatpush1.bf16.msra.mxu1 %v2833_v7  ;;  %v3167_v5 = vld [vmem:[#allocation10 + $0x2e4] ss:$16 sps:$4 sm:$0xff]   ;;  %v3162_v7 = vld [vmem:[#allocation10 + $0xe0] ss:$16 sps:$4 sm:$0xff]  }
  0x59   :  { %569 = vmatprep.subr.bf16.mxu0 %v2892_v8  ;;  %610 = vmatprep.subr.bf16.mxu1 %v2894_v10  ;;  %v3165_v8 = vld [vmem:[#allocation10 + $0x2e0] ss:$16 sps:$4 sm:$0xff]   ;;  %v3173_v10 = vld [vmem:[#allocation10 + $0x2c4] ss:$16 sps:$4 sm:$0xff]  }
  0x5a   :  { %v3203_v30 = vld [vmem:[#allocation10 + $0x224] ss:$16 sps:$4 sm:$0xff]   ;;  %v3231_v51 = vld [vmem:[#allocation10 + $0x380] ss:$16 sps:$4 sm:$0xff]  }
  0x5b   :  { %520 = vmatmul.mubr.bf16.vlgmr.msra.gmra.mxu0 %v3726_v13  ;;  %561 = vmatmul.mubr.bf16.vlgmr.msra.gmra.mxu1 %v3726_v13  ;;  %v3209_v34 = vld [vmem:[#allocation10 + $0x204] ss:$16 sps:$4 sm:$0xff]   ;;  %v3243_v59 = vld [vmem:[#allocation10 + $0x340] ss:$16 sps:$4 sm:$0xff]  }
  0x5c   :  { %570 = vmatpush1.bf16.msra.mxu0 %v2891_v15  ;;  %611 = vmatpush1.bf16.msra.mxu1 %v2893_v16  ;;  %v3179_v15 = vld [vmem:[#allocation10 + $0x2a4] ss:$16 sps:$4 sm:$0xff]   ;;  %v3174_v16 = vld [vmem:[#allocation10 + $0xa0] ss:$16 sps:$4 sm:$0xff]  }
  0x5d   :  { %571 = vmatprep.subr.bf16.mxu0 %v2884_v17  ;;  %612 = vmatprep.subr.bf16.mxu1 %v2886_v19  ;;  %v3177_v17 = vld [vmem:[#allocation10 + $0x2a0] ss:$16 sps:$4 sm:$0xff]   ;;  %v3185_v19 = vld [vmem:[#allocation10 + $0x284] ss:$16 sps:$4 sm:$0xff]  }
  0x5e   :  { %601 = vmatprep.mubr.bf16.mxu0 %v3666_v1  ;;  %642 = vmatprep.mubr.bf16.mxu1 %v3666_v1  ;;  %v2862_v1 = vcombine.high %v130_v37, %v134_v38  ;;  %v3212_v37 = vld [vmem:[#allocation10 + $0x1e4] ss:$16 sps:$4 sm:$0xff]  }
  0x5f   :  { %v3215_v38 = vld [vmem:[#allocation10 + $0x3e4] ss:$16 sps:$4 sm:$0xff]  }
  0x60   :  { %572 = vmatpush1.bf16.msra.mxu0 %v2883_v23  ;;  %613 = vmatpush1.bf16.msra.mxu1 %v2885_v24  ;;  %v3191_v23 = vld [vmem:[#allocation10 + $0x264] ss:$16 sps:$4 sm:$0xff]   ;;  %v3189_v24 = vld [vmem:[#allocation10 + $0x260] ss:$16 sps:$4 sm:$0xff]  }
  0x61   :  { %573 = vmatprep.subr.bf16.mxu0 %v2876_v25  ;;  %614 = vmatprep.subr.bf16.mxu1 %v2878_v27  ;;  %v3194_v25 = vld [vmem:[#allocation10 + $0x44] ss:$16 sps:$4 sm:$0xff]   ;;  %v3192_v27 = vld [vmem:[#allocation10 + $0x40] ss:$16 sps:$4 sm:$0xff]  }
  0x62   :  { %v3221_v42 = vld [vmem:[#allocation10 + $0x3c4] ss:$16 sps:$4 sm:$0xff]  }
  0x63   :  { %v3224_v44 = vld [vmem:[#allocation10 + $0x1a4] ss:$16 sps:$4 sm:$0xff]  }
  0x64   :  { %574 = vmatpush1.bf16.msra.mxu0 %v2875_v31  ;;  %615 = vmatpush1.bf16.msra.mxu1 %v2877_v32  ;;  %v3198_v31 = vld [vmem:[#allocation10 + $0x20] ss:$16 sps:$4 sm:$0xff]   ;;  %v3227_v45 = vld [vmem:[#allocation10 + $0x3a4] ss:$16 sps:$4 sm:$0xff]  }
  0x65   :  { %575 = vmatprep.subr.bf16.mxu0 %v2868_v33  ;;  %616 = vmatprep.subr.bf16.mxu1 %v2870_v35  ;;  %v3201_v32 = vld [vmem:[#allocation10 + $0x220] ss:$16 sps:$4 sm:$0xff]   ;;  %v3206_v33 = vld [vmem:[#allocation10 + $0x4] ss:$16 sps:$4 sm:$0xff]  }
  0x66   :  { %v3204_v35 = vld [vmem:[#allocation10] ss:$16 sps:$4 sm:$0xff]   ;;  %v3233_v49 = vld [vmem:[#allocation10 + $0x384] ss:$16 sps:$4 sm:$0xff]  }
  0x67   :  { %v3236_v52 = vld [vmem:[#allocation10 + $0x164] ss:$16 sps:$4 sm:$0xff]  }
  0x68   :  { %576 = vmatpush1.bf16.msra.mxu0 %v2867_v39  ;;  %617 = vmatpush1.bf16.msra.mxu1 %v2869_v40  ;;  %v3210_v39 = vld [vmem:[#allocation10 + $0x1e0] ss:$16 sps:$4 sm:$0xff]   ;;  %v3239_v53 = vld [vmem:[#allocation10 + $0x364] ss:$16 sps:$4 sm:$0xff]  }
  0x69   :  { %577 = vmatprep.subr.bf16.mxu0 %v2860_v41  ;;  %618 = vmatprep.subr.bf16.mxu1 %v2862_v1  ;;  %v3213_v40 = vld [vmem:[#allocation10 + $0x3e0] ss:$16 sps:$4 sm:$0xff]   ;;  %v3218_v41 = vld [vmem:[#allocation10 + $0x1c4] ss:$16 sps:$4 sm:$0xff]  }
  0x6a   :  { %v3216_v1 = vld [vmem:[#allocation10 + $0x1c0] ss:$16 sps:$4 sm:$0xff]   ;;  %v3245_v57 = vld [vmem:[#allocation10 + $0x344] ss:$16 sps:$4 sm:$0xff]  }
  0x6b   :  { %v3248_v60 = vld [vmem:[#allocation10 + $0x124] ss:$16 sps:$4 sm:$0xff]  }
  0x6c   :  { %578 = vmatpush1.bf16.msra.mxu0 %v2859_v46  ;;  %619 = vmatpush1.bf16.msra.mxu1 %v2861_v47  ;;  %v3222_v46 = vld [vmem:[#allocation10 + $0x1a0] ss:$16 sps:$4 sm:$0xff]   ;;  %v3251_v61 = vld [vmem:[#allocation10 + $0x324] ss:$16 sps:$4 sm:$0xff]  }
  0x6d   :  { %579 = vmatprep.subr.bf16.mxu0 %v2852_v48  ;;  %620 = vmatprep.subr.bf16.mxu1 %v2854_v50  ;;  %v3225_v47 = vld [vmem:[#allocation10 + $0x3a0] ss:$16 sps:$4 sm:$0xff]   ;;  %v3230_v48 = vld [vmem:[#allocation10 + $0x184] ss:$16 sps:$4 sm:$0xff]  }
  0x6e   :  { %v3228_v50 = vld [vmem:[#allocation10 + $0x180] ss:$16 sps:$4 sm:$0xff]  }
  0x70   :  { %580 = vmatpush1.bf16.msra.mxu0 %v2851_v54  ;;  %621 = vmatpush1.bf16.msra.mxu1 %v2853_v55  ;;  %v3234_v54 = vld [vmem:[#allocation10 + $0x160] ss:$16 sps:$4 sm:$0xff]  }
  0x71   :  { %581 = vmatprep.subr.bf16.mxu0 %v2844_v56  ;;  %622 = vmatprep.subr.bf16.mxu1 %v2846_v58  ;;  %v3237_v55 = vld [vmem:[#allocation10 + $0x360] ss:$16 sps:$4 sm:$0xff]   ;;  %v3242_v56 = vld [vmem:[#allocation10 + $0x144] ss:$16 sps:$4 sm:$0xff]  }
  0x72   :  { %v3240_v58 = vld [vmem:[#allocation10 + $0x140] ss:$16 sps:$4 sm:$0xff]  }
  0x74   :  { %582 = vmatpush1.bf16.msra.mxu0 %v2843_v62  ;;  %623 = vmatpush1.bf16.msra.mxu1 %v2845_v63  ;;  %v3246_v62 = vld [vmem:[#allocation10 + $0x120] ss:$16 sps:$4 sm:$0xff]  }
  0x75   :  { %583 = vmatprep.subr.bf16.mxu0 %v2836_v0  ;;  %624 = vmatprep.subr.bf16.mxu1 %v2838_v2  ;;  %v3249_v63 = vld [vmem:[#allocation10 + $0x320] ss:$16 sps:$4 sm:$0xff]   ;;  %v3254_v0 = vld [vmem:[#allocation10 + $0x104] ss:$16 sps:$4 sm:$0xff]  }
  0x76   :  { %v3257_v2 = vld [vmem:[#allocation10 + $0x304] ss:$16 sps:$4 sm:$0xff]  }
  0x78   :  { %584 = vmatpush1.bf16.msra.mxu0 %v2835_v4  ;;  %625 = vmatpush1.bf16.msra.mxu1 %v2837_v6  ;;  %v3255_v4 = vld [vmem:[#allocation10 + $0x300] ss:$16 sps:$4 sm:$0xff]   ;;  %v3263_v6 = vld [vmem:[#allocation10 + $0x6e4] ss:$16 sps:$4 sm:$0xff]  }
  0x79   :  { %2302 = vmatprep.subr.bf16.mxu0 %v3164_v3  ;;  %2343 = vmatprep.subr.bf16.mxu1 %v3167_v5  ;;  %v3252_v3 = vld [vmem:[#allocation10 + $0x100] ss:$16 sps:$4 sm:$0xff]   ;;  %v3260_v5 = vld [vmem:[#allocation10 + $0x4e4] ss:$16 sps:$4 sm:$0xff]  }
  0x7b   :  { %602 = vmatmul.mubr.bf16.vlgmr.msra.gmra.mxu0 %v3726_v13  ;;  %643 = vmatmul.mubr.bf16.vlgmr.msra.gmra.mxu1 %v3726_v13  ;;  %v3186_v13 = vld [vmem:[#allocation10 + $0x60] ss:$16 sps:$4 sm:$0xff]  }
  0x7c   :  { %2303 = vmatpush1.bf16.msra.mxu0 %v3162_v7  ;;  %2344 = vmatpush1.bf16.msra.mxu1 %v3165_v8  ;;  %v680_v7 = vlaneseq }
  0x7d   :  { %2304 = vmatprep.subr.bf16.mxu0 %v3170_v9  ;;  %2345 = vmatprep.subr.bf16.mxu1 %v3173_v10  ;;  %v3737_v10 = vld [vmem:[#allocation9] sm:$0xff] }
  0x7e   :  { %v3734_v8 = vshrl.u32 %v680_v7, 7  ;;  %v3302_v7 = vld [vmem:[#allocation10 + $0x404] ss:$16 sps:$4 sm:$0xff]  }
  0x80   :  { %2305 = vmatpush1.bf16.msra.mxu0 %v3168_v11  ;;  %2346 = vmatpush1.bf16.msra.mxu1 %v3171_v12  ;;  %v698_v9 = vsub.s32 4, %v3734_v8  ;;  %v706_v12 = vsub.s32 6, %v3734_v8 }
  0x81   :  { %2306 = vmatprep.subr.bf16.mxu0 %v3176_v14  ;;  %2347 = vmatprep.subr.bf16.mxu1 %v3179_v15  ;;  %v3747_v15 = vsub.s32 0, %v3734_v8 }
  0x82   :  { %v3740_v11 = vrot.slane %v3737_v10, %v698_v9  ;;  %v3744_v14 = vrot.slane %v3737_v10, %v706_v12 }
  0x84   :  { %2307 = vmatpush1.bf16.msra.mxu0 %v3174_v16  ;;  %2348 = vmatpush1.bf16.msra.mxu1 %v3177_v17  ;;  %v3750_v16 = vsub.s32 2, %v3734_v8  ;;  %v3753_v17 = vsub.s32 1, %v3734_v8 }
  0x85   :  { %2308 = vmatprep.subr.bf16.mxu0 %v3182_v18  ;;  %2349 = vmatprep.subr.bf16.mxu1 %v3185_v19  ;;  %v3756_v18 = vsub.s32 3, %v3734_v8  ;;  %v683_v19 = vrot.slane %v3737_v10, %v3747_v15 }
  0x88   :  { %2309 = vmatpush1.bf16.msra.mxu0 %v3180_v20  ;;  %2350 = vmatpush1.bf16.msra.mxu1 %v3183_v21  ;;  %v691_v20 = vrot.slane %v3737_v10, %v3750_v16  ;;  %v687_v21 = vrot.slane %v3737_v10, %v3753_v17 }
  0x89   :  { %2310 = vmatprep.subr.bf16.mxu0 %v3188_v22  ;;  %2351 = vmatprep.subr.bf16.mxu1 %v3191_v23  ;;  %v695_v23 = vrot.slane %v3737_v10, %v3756_v18 }
  0x8c   :  { %2311 = vmatpush1.bf16.msra.mxu0 %v3186_v13  ;;  %2352 = vmatpush1.bf16.msra.mxu1 %v3189_v24 }
  0x8d   :  { %2312 = vmatprep.subr.bf16.mxu0 %v3194_v25  ;;  %2353 = vmatprep.subr.bf16.mxu1 %v3197_v26 }
  0x90   :  { %2313 = vmatpush1.bf16.msra.mxu0 %v3192_v27  ;;  %2354 = vmatpush1.bf16.msra.mxu1 %v3195_v28 }
  0x91   :  { %2314 = vmatprep.subr.bf16.mxu0 %v3200_v29  ;;  %2355 = vmatprep.subr.bf16.mxu1 %v3203_v30 }
  0x94   :  { %2315 = vmatpush1.bf16.msra.mxu0 %v3198_v31  ;;  %2356 = vmatpush1.bf16.msra.mxu1 %v3201_v32 }
  0x95   :  { %2316 = vmatprep.subr.bf16.mxu0 %v3206_v33  ;;  %2357 = vmatprep.subr.bf16.mxu1 %v3209_v34 }
  0x98   :  { %2317 = vmatpush1.bf16.msra.mxu0 %v3204_v35  ;;  %2358 = vmatpush1.bf16.msra.mxu1 %v3207_v36 }
  0x99   :  { %2318 = vmatprep.subr.bf16.mxu0 %v3212_v37  ;;  %2359 = vmatprep.subr.bf16.mxu1 %v3215_v38 }
  0x9c   :  { %2319 = vmatpush2.bf16.msra.mxu0 %v3210_v39  ;;  %2360 = vmatpush2.bf16.msra.mxu1 %v3213_v40  ;;  %v3258_v40 = vld [vmem:[#allocation10 + $0x4e0] ss:$16 sps:$4 sm:$0xff]  }
  0x9d   :  { %2320 = vmatprep.subr.bf16.mxu0 %v3218_v41  ;;  %2361 = vmatprep.subr.bf16.mxu1 %v3221_v42 }
  0xa0   :  { %2321 = vmatpush2.bf16.msra.mxu0 %v3216_v1  ;;  %2362 = vmatpush2.bf16.msra.mxu1 %v3219_v43  ;;  %v3261_v1 = vld [vmem:[#allocation10 + $0x6e0] ss:$16 sps:$4 sm:$0xff]   ;;  %v3266_v43 = vld [vmem:[#allocation10 + $0x4c4] ss:$16 sps:$4 sm:$0xff]  }
  0xa1   :  { %2322 = vmatprep.subr.bf16.mxu0 %v3224_v44  ;;  %2363 = vmatprep.subr.bf16.mxu1 %v3227_v45  ;;  %v3269_v44 = vld [vmem:[#allocation10 + $0x6c4] ss:$16 sps:$4 sm:$0xff]   ;;  %v3264_v45 = vld [vmem:[#allocation10 + $0x4c0] ss:$16 sps:$4 sm:$0xff]  }
  0xa4   :  { %2323 = vmatpush2.bf16.msra.mxu0 %v3222_v46  ;;  %2364 = vmatpush2.bf16.msra.mxu1 %v3225_v47  ;;  %v3267_v46 = vld [vmem:[#allocation10 + $0x6c0] ss:$16 sps:$4 sm:$0xff]   ;;  %v3272_v47 = vld [vmem:[#allocation10 + $0x4a4] ss:$16 sps:$4 sm:$0xff]  }
  0xa5   :  { %2324 = vmatprep.subr.bf16.mxu0 %v3230_v48  ;;  %2365 = vmatprep.subr.bf16.mxu1 %v3233_v49  ;;  %v3275_v48 = vld [vmem:[#allocation10 + $0x6a4] ss:$16 sps:$4 sm:$0xff]   ;;  %v3270_v49 = vld [vmem:[#allocation10 + $0x4a0] ss:$16 sps:$4 sm:$0xff]  }
  0xa8   :  { %2325 = vmatpush2.bf16.msra.mxu0 %v3228_v50  ;;  %2366 = vmatpush2.bf16.msra.mxu1 %v3231_v51  ;;  %v3273_v50 = vld [vmem:[#allocation10 + $0x6a0] ss:$16 sps:$4 sm:$0xff]   ;;  %v3278_v51 = vld [vmem:[#allocation10 + $0x484] ss:$16 sps:$4 sm:$0xff]  }
  0xa9   :  { %2326 = vmatprep.subr.bf16.mxu0 %v3236_v52  ;;  %2367 = vmatprep.subr.bf16.mxu1 %v3239_v53  ;;  %v3281_v52 = vld [vmem:[#allocation10 + $0x684] ss:$16 sps:$4 sm:$0xff]   ;;  %v3276_v53 = vld [vmem:[#allocation10 + $0x480] ss:$16 sps:$4 sm:$0xff]  }
  0xac   :  { %2327 = vmatpush2.bf16.msra.mxu0 %v3234_v54  ;;  %2368 = vmatpush2.bf16.msra.mxu1 %v3237_v55  ;;  %v3279_v54 = vld [vmem:[#allocation10 + $0x680] ss:$16 sps:$4 sm:$0xff]   ;;  %v3284_v55 = vld [vmem:[#allocation10 + $0x464] ss:$16 sps:$4 sm:$0xff]  }
  0xad   :  { %2328 = vmatprep.subr.bf16.mxu0 %v3242_v56  ;;  %2369 = vmatprep.subr.bf16.mxu1 %v3245_v57  ;;  %v3287_v56 = vld [vmem:[#allocation10 + $0x664] ss:$16 sps:$4 sm:$0xff]   ;;  %v3282_v57 = vld [vmem:[#allocation10 + $0x460] ss:$16 sps:$4 sm:$0xff]  }
  0xb0   :  { %2329 = vmatpush2.bf16.msra.mxu0 %v3240_v58  ;;  %2370 = vmatpush2.bf16.msra.mxu1 %v3243_v59  ;;  %v3285_v58 = vld [vmem:[#allocation10 + $0x660] ss:$16 sps:$4 sm:$0xff]   ;;  %v3290_v59 = vld [vmem:[#allocation10 + $0x444] ss:$16 sps:$4 sm:$0xff]  }
  0xb1   :  { %2330 = vmatprep.subr.bf16.mxu0 %v3248_v60  ;;  %2371 = vmatprep.subr.bf16.mxu1 %v3251_v61  ;;  %v3293_v60 = vld [vmem:[#allocation10 + $0x644] ss:$16 sps:$4 sm:$0xff]   ;;  %v3288_v61 = vld [vmem:[#allocation10 + $0x440] ss:$16 sps:$4 sm:$0xff]  }
  0xb4   :  { %2331 = vmatpush2.bf16.msra.mxu0 %v3246_v62  ;;  %2372 = vmatpush2.bf16.msra.mxu1 %v3249_v63  ;;  %v702_v62 = vsub.s32 5, %v3734_v8  ;;  %v3291_v63 = vld [vmem:[#allocation10 + $0x640] ss:$16 sps:$4 sm:$0xff]  }
  0xb5   :  { %2332 = vmatprep.subr.bf16.mxu0 %v3254_v0  ;;  %2373 = vmatprep.subr.bf16.mxu1 %v3257_v2  ;;  %v3296_v0 = vld [vmem:[#allocation10 + $0x424] ss:$16 sps:$4 sm:$0xff]   ;;  %v710_v2 = vsub.s32 7, %v3734_v8  ;;  %v3300_v8 = vld [vmem:[#allocation10 + $0x400] ss:$16 sps:$4 sm:$0xff]  }
  0xb7   :  { %v711_v12 = vrot.slane %v3737_v10, %v710_v2  ;;  %v3350_v2 = vld [vmem:[#allocation10 + $0x504] ss:$16 sps:$4 sm:$0xff]  }
  0xb8   :  { %2333 = vmatpush2.bf16.msra.mxu0 %v3252_v3  ;;  %2374 = vmatpush2.bf16.msra.mxu1 %v3255_v4  ;;  %v3299_v3 = vld [vmem:[#allocation10 + $0x624] ss:$16 sps:$4 sm:$0xff]   ;;  %v3294_v4 = vld [vmem:[#allocation10 + $0x420] ss:$16 sps:$4 sm:$0xff]  }
  0xb9   :  { %2384 = vmatprep.subr.bf16.mxu0 %v3260_v5  ;;  %2425 = vmatprep.subr.bf16.mxu1 %v3263_v6  ;;  %v703_v5 = vrot.slane %v3737_v10, %v702_v62  ;;  %v3297_v6 = vld [vmem:[#allocation10 + $0x620] ss:$16 sps:$4 sm:$0xff]  }
  0xba   :  { %v3342_v62 = vld [vmem:[#allocation10 + $0x520] ss:$16 sps:$4 sm:$0xff]  }
 0x11b   :  { %v521_v22 = vpop.f32.mrf.mxu0  ;;  %v562_v24 = vpop.f32.mrf.mxu1 }
 0x11c   :  { %v720_v13 = vadd.f32 %v683_v19, %v521_v22  ;;  %v722_v25 = vadd.f32 %v691_v20, %v562_v24  ;;  %v3305_v19 = vld [vmem:[#allocation10 + $0x604] ss:$16 sps:$4 sm:$0xff]  }
 0x11d   :  { %v523_v26 = vpop.f32.mrf.mxu0  ;;  %v564_v28 = vpop.f32.mrf.mxu1  ;;  %v3308_v24 = vld [vmem:[#allocation10 + $0x5e4] ss:$16 sps:$4 sm:$0xff]  }
 0x11e   :  { %v721_v27 = vadd.f32 %v687_v21, %v523_v26  ;;  %v728_v29 = vmax.f32 %v720_v13, 0.0  ;;  %v730_v30 = vmax.f32 %v722_v25, 0.0  ;;  %v723_v31 = vadd.f32 %v695_v23, %v564_v28  ;;  %v3303_v13 = vld [vmem:[#allocation10 + $0x600] ss:$16 sps:$4 sm:$0xff]  }
 0x11f   :  { %v525_v32 = vpop.f32.mrf.mxu0  ;;  %v566_v34 = vpop.f32.mrf.mxu1 }
 0x120   :  { %v729_v33 = vmax.f32 %v721_v27, 0.0  ;;  %v731_v35 = vmax.f32 %v723_v31, 0.0  ;;  %v3766_v37 = vpack.c.bf16 %v730_v30, %v730_v30  ;;  %v3770_v41 = vpack.c.bf16 %v728_v29, %v728_v29  ;;  %v3311_v27 = vld [vmem:[#allocation10 + $0x7e4] ss:$16 sps:$4 sm:$0xff]   ;;  %v3306_v31 = vld [vmem:[#allocation10 + $0x5e0] ss:$16 sps:$4 sm:$0xff]  }
 0x121   :  { %v526_v36 = vpop.f32.mrf.mxu0  ;;  %v567_v39 = vpop.f32.mrf.mxu1  ;;  %v3309_v34 = vld [vmem:[#allocation10 + $0x7e0] ss:$16 sps:$4 sm:$0xff]  }
 0x122   :  { %v3768_v38 = vpack.c.bf16 %v729_v33, %v729_v33  ;;  %v3772_v42 = vpack.c.bf16 %v731_v35, %v731_v35  ;;  %v3314_v35 = vld [vmem:[#allocation10 + $0x5c4] ss:$16 sps:$4 sm:$0xff]  }
 0x123   :  { %v3317_v39 = vld [vmem:[#allocation10 + $0x7c4] ss:$16 sps:$4 sm:$0xff]  }
 0x124   :  { %2334 = vmatprep.mubr.bf16.mxu0 %v3768_v38  ;;  %2375 = vmatprep.mubr.bf16.mxu1 %v3772_v42 }
 0x125   :  { %2335 = vmatmul.mubr.bf16.vlgmr.msra.gmra.mxu0 %v3770_v41  ;;  %2376 = vmatmul.mubr.bf16.vlgmr.msra.gmra.mxu1 %v3766_v37 }
 0x126   :  { %2385 = vmatpush1.bf16.msra.mxu0 %v3258_v40  ;;  %2426 = vmatpush1.bf16.msra.mxu1 %v3261_v1  ;;  %v3312_v40 = vld [vmem:[#allocation10 + $0x5c0] ss:$16 sps:$4 sm:$0xff]  }
 0x127   :  { %2386 = vmatprep.subr.bf16.mxu0 %v3266_v43  ;;  %2427 = vmatprep.subr.bf16.mxu1 %v3269_v44  ;;  %v3315_v1 = vld [vmem:[#allocation10 + $0x7c0] ss:$16 sps:$4 sm:$0xff]   ;;  %v3320_v43 = vld [vmem:[#allocation10 + $0x5a4] ss:$16 sps:$4 sm:$0xff]  }
 0x128   :  { %v3323_v44 = vld [vmem:[#allocation10 + $0x7a4] ss:$16 sps:$4 sm:$0xff]  }
 0x12a   :  { %2387 = vmatpush1.bf16.msra.mxu0 %v3264_v45  ;;  %2428 = vmatpush1.bf16.msra.mxu1 %v3267_v46  ;;  %v3318_v45 = vld [vmem:[#allocation10 + $0x5a0] ss:$16 sps:$4 sm:$0xff]  }
 0x12b   :  { %2388 = vmatprep.subr.bf16.mxu0 %v3272_v47  ;;  %2429 = vmatprep.subr.bf16.mxu1 %v3275_v48  ;;  %v3321_v46 = vld [vmem:[#allocation10 + $0x7a0] ss:$16 sps:$4 sm:$0xff]   ;;  %v3326_v47 = vld [vmem:[#allocation10 + $0x584] ss:$16 sps:$4 sm:$0xff]  }
 0x12c   :  { %v3329_v48 = vld [vmem:[#allocation10 + $0x784] ss:$16 sps:$4 sm:$0xff]  }
 0x12e   :  { %2389 = vmatpush1.bf16.msra.mxu0 %v3270_v49  ;;  %2430 = vmatpush1.bf16.msra.mxu1 %v3273_v50  ;;  %v3324_v49 = vld [vmem:[#allocation10 + $0x580] ss:$16 sps:$4 sm:$0xff]  }
 0x12f   :  { %2390 = vmatprep.subr.bf16.mxu0 %v3278_v51  ;;  %2431 = vmatprep.subr.bf16.mxu1 %v3281_v52  ;;  %v3327_v50 = vld [vmem:[#allocation10 + $0x780] ss:$16 sps:$4 sm:$0xff]   ;;  %v3332_v51 = vld [vmem:[#allocation10 + $0x564] ss:$16 sps:$4 sm:$0xff]  }
 0x130   :  { %v3335_v52 = vld [vmem:[#allocation10 + $0x764] ss:$16 sps:$4 sm:$0xff]  }
 0x132   :  { %2391 = vmatpush1.bf16.msra.mxu0 %v3276_v53  ;;  %2432 = vmatpush1.bf16.msra.mxu1 %v3279_v54  ;;  %v3330_v53 = vld [vmem:[#allocation10 + $0x560] ss:$16 sps:$4 sm:$0xff]  }
 0x133   :  { %2392 = vmatprep.subr.bf16.mxu0 %v3284_v55  ;;  %2433 = vmatprep.subr.bf16.mxu1 %v3287_v56  ;;  %v3333_v54 = vld [vmem:[#allocation10 + $0x760] ss:$16 sps:$4 sm:$0xff]   ;;  %v3338_v55 = vld [vmem:[#allocation10 + $0x544] ss:$16 sps:$4 sm:$0xff]  }
 0x134   :  { %v3341_v56 = vld [vmem:[#allocation10 + $0x744] ss:$16 sps:$4 sm:$0xff]  }
 0x136   :  { %2393 = vmatpush1.bf16.msra.mxu0 %v3282_v57  ;;  %2434 = vmatpush1.bf16.msra.mxu1 %v3285_v58  ;;  %v3336_v57 = vld [vmem:[#allocation10 + $0x540] ss:$16 sps:$4 sm:$0xff]  }
 0x137   :  { %2394 = vmatprep.subr.bf16.mxu0 %v3290_v59  ;;  %2435 = vmatprep.subr.bf16.mxu1 %v3293_v60  ;;  %v3339_v58 = vld [vmem:[#allocation10 + $0x740] ss:$16 sps:$4 sm:$0xff]   ;;  %v3344_v59 = vld [vmem:[#allocation10 + $0x524] ss:$16 sps:$4 sm:$0xff]  }
 0x138   :  { %v3347_v60 = vld [vmem:[#allocation10 + $0x724] ss:$16 sps:$4 sm:$0xff]  }
 0x13a   :  { %2395 = vmatpush1.bf16.msra.mxu0 %v3288_v61  ;;  %2436 = vmatpush1.bf16.msra.mxu1 %v3291_v63 }
 0x13b   :  { %2396 = vmatprep.subr.bf16.mxu0 %v3296_v0  ;;  %v3781_v9 = vpop.f32.mrf.mxu0  ;;  %2437 = vmatprep.subr.bf16.mxu1 %v3299_v3  ;;  %v3784_v20 = vpop.f32.mrf.mxu1  ;;  %v3345_v0 = vld [vmem:[#allocation10 + $0x720] ss:$16 sps:$4 sm:$0xff]   ;;  %v3353_v3 = vld [vmem:[#allocation10 + $0x704] ss:$16 sps:$4 sm:$0xff]  }
 0x13c   :  { %v726_v61 = vadd.f32 %v3744_v14, %v3784_v20  ;;  %v724_v63 = vadd.f32 %v3740_v11, %v3781_v9  ;;  %v3359_v14 = vld [vmem:[#allocation10 + $0x2ec] ss:$16 sps:$4 sm:$0xff]   ;;  %v3354_v11 = vld [vmem:[#allocation10 + $0xe8] ss:$16 sps:$4 sm:$0xff]  }
 0x13d   :  { %v605_v21 = vpop.f32.mrf.mxu0  ;;  %v646_v23 = vpop.f32.mrf.mxu1  ;;  %v3357_v20 = vld [vmem:[#allocation10 + $0x2e8] ss:$16 sps:$4 sm:$0xff]  }
 0x13e   :  { %2397 = vmatpush1.bf16.msra.mxu0 %v3294_v4  ;;  %v725_v22 = vadd.f32 %v703_v5, %v605_v21  ;;  %2438 = vmatpush1.bf16.msra.mxu1 %v3297_v6  ;;  %v727_v26 = vadd.f32 %v711_v12, %v646_v23  ;;  %v734_v4 = vmax.f32 %v726_v61, 0.0  ;;  %v3348_v5 = vld [vmem:[#allocation10 + $0x500] ss:$16 sps:$4 sm:$0xff]   ;;  %v732_v6 = vmax.f32 %v724_v63, 0.0  ;;  %v3356_v12 = vld [vmem:[#allocation10 + $0xec] ss:$16 sps:$4 sm:$0xff]  }
 0x13f   :  { %2398 = vmatprep.subr.bf16.mxu0 %v3302_v7  ;;  %v607_v25 = vpop.f32.mrf.mxu0  ;;  %2439 = vmatprep.subr.bf16.mxu1 %v3305_v19  ;;  %v648_v29 = vpop.f32.mrf.mxu1  ;;  %v3351_v7 = vld [vmem:[#allocation10 + $0x700] ss:$16 sps:$4 sm:$0xff]   ;;  %v3362_v21 = vld [vmem:[#allocation10 + $0xcc] ss:$16 sps:$4 sm:$0xff]   ;;  %v3363_v23 = vld [vmem:[#allocation10 + $0x2c8] ss:$16 sps:$4 sm:$0xff]  }
 0x140   :  { %v733_v28 = vmax.f32 %v725_v22, 0.0  ;;  %v735_v10 = vmax.f32 %v727_v26, 0.0  ;;  %v3796_v19 = vpack.c.bf16 %v734_v4, %v734_v4  ;;  %v3798_v9 = vpack.c.bf16 %v732_v6, %v732_v6  ;;  %v3360_v22 = vld [vmem:[#allocation10 + $0xc8] ss:$16 sps:$4 sm:$0xff]   ;;  %v3422_v61 = vld [vmem:[#allocation10 + $0x18c] ss:$16 sps:$4 sm:$0xff]  }
 0x141   :  { %v608_v30 = vpop.f32.mrf.mxu0  ;;  %v649_v33 = vpop.f32.mrf.mxu1  ;;  %v3366_v25 = vld [vmem:[#allocation10 + $0xa8] ss:$16 sps:$4 sm:$0xff]   ;;  %v3434_v6 = vld [vmem:[#allocation10 + $0x14c] ss:$16 sps:$4 sm:$0xff]  }
 0x142   :  { %2399 = vmatpush1.bf16.msra.mxu0 %v3300_v8  ;;  %v3786_v32 = vpack.c.bf16 %v733_v28, %v733_v28  ;;  %2440 = vmatpush1.bf16.msra.mxu1 %v3303_v13  ;;  %v3788_v36 = vpack.c.bf16 %v735_v10, %v735_v10  ;;  %v3365_v8 = vld [vmem:[#allocation10 + $0x2cc] ss:$16 sps:$4 sm:$0xff]   ;;  %v3369_v26 = vld [vmem:[#allocation10 + $0x2a8] ss:$16 sps:$4 sm:$0xff]  }
 0x143   :  { %2400 = vmatprep.subr.bf16.mxu0 %v3308_v24  ;;  %2441 = vmatprep.subr.bf16.mxu1 %v3311_v27  ;;  %v3368_v13 = vld [vmem:[#allocation10 + $0xac] ss:$16 sps:$4 sm:$0xff]   ;;  %v3372_v29 = vld [vmem:[#allocation10 + $0x88] ss:$16 sps:$4 sm:$0xff]  }
 0x144   :  { %2416 = vmatprep.mubr.bf16.mxu0 %v3786_v32  ;;  %2457 = vmatprep.mubr.bf16.mxu1 %v3788_v36  ;;  %v3371_v24 = vld [vmem:[#allocation10 + $0x2ac] ss:$16 sps:$4 sm:$0xff]   ;;  %v3420_v63 = vld [vmem:[#allocation10 + $0x188] ss:$16 sps:$4 sm:$0xff]  }
 0x145   :  { %v3374_v27 = vld [vmem:[#allocation10 + $0x8c] ss:$16 sps:$4 sm:$0xff]   ;;  %v3426_v4 = vld [vmem:[#allocation10 + $0x168] ss:$16 sps:$4 sm:$0xff]  }
 0x146   :  { %2401 = vmatpush2.bf16.msra.mxu0 %v3306_v31  ;;  %2442 = vmatpush2.bf16.msra.mxu1 %v3309_v34  ;;  %v3377_v28 = vld [vmem:[#allocation10 + $0x28c] ss:$16 sps:$4 sm:$0xff]   ;;  %v3381_v31 = vld [vmem:[#allocation10 + $0x268] ss:$16 sps:$4 sm:$0xff]  }
 0x147   :  { %2402 = vmatprep.subr.bf16.mxu0 %v3314_v35  ;;  %2443 = vmatprep.subr.bf16.mxu1 %v3317_v39  ;;  %v3380_v10 = vld [vmem:[#allocation10 + $0x6c] ss:$16 sps:$4 sm:$0xff]   ;;  %v3384_v35 = vld [vmem:[#allocation10 + $0x48] ss:$16 sps:$4 sm:$0xff]  }
 0x148   :  { %v3383_v30 = vld [vmem:[#allocation10 + $0x26c] ss:$16 sps:$4 sm:$0xff]   ;;  %v3387_v39 = vld [vmem:[#allocation10 + $0x248] ss:$16 sps:$4 sm:$0xff]  }
 0x149   :  { %v3386_v33 = vld [vmem:[#allocation10 + $0x4c] ss:$16 sps:$4 sm:$0xff]  }
 0x14a   :  { %2403 = vmatpush2.bf16.msra.mxu0 %v3312_v40  ;;  %2444 = vmatpush2.bf16.msra.mxu1 %v3315_v1  ;;  %v3389_v34 = vld [vmem:[#allocation10 + $0x24c] ss:$16 sps:$4 sm:$0xff]  }
 0x14b   :  { %2404 = vmatprep.subr.bf16.mxu0 %v3320_v43  ;;  %2445 = vmatprep.subr.bf16.mxu1 %v3323_v44  ;;  %v3392_v40 = vld [vmem:[#allocation10 + $0x2c] ss:$16 sps:$4 sm:$0xff]   ;;  %v3390_v43 = vld [vmem:[#allocation10 + $0x28] ss:$16 sps:$4 sm:$0xff]  }
 0x14c   :  { %v3395_v1 = vld [vmem:[#allocation10 + $0x22c] ss:$16 sps:$4 sm:$0xff]   ;;  %v3393_v44 = vld [vmem:[#allocation10 + $0x228] ss:$16 sps:$4 sm:$0xff]  }
 0x14e   :  { %2405 = vmatpush2.bf16.msra.mxu0 %v3318_v45  ;;  %2446 = vmatpush2.bf16.msra.mxu1 %v3321_v46  ;;  %v3398_v45 = vld [vmem:[#allocation10 + $0xc] ss:$16 sps:$4 sm:$0xff]  }
 0x14f   :  { %2406 = vmatprep.subr.bf16.mxu0 %v3326_v47  ;;  %2447 = vmatprep.subr.bf16.mxu1 %v3329_v48  ;;  %v3401_v46 = vld [vmem:[#allocation10 + $0x20c] ss:$16 sps:$4 sm:$0xff]   ;;  %v3396_v47 = vld [vmem:[#allocation10 + $0x8] ss:$16 sps:$4 sm:$0xff]  }
 0x150   :  { %v3399_v48 = vld [vmem:[#allocation10 + $0x208] ss:$16 sps:$4 sm:$0xff]  }
 0x152   :  { %2407 = vmatpush2.bf16.msra.mxu0 %v3324_v49  ;;  %2448 = vmatpush2.bf16.msra.mxu1 %v3327_v50  ;;  %v3404_v49 = vld [vmem:[#allocation10 + $0x1ec] ss:$16 sps:$4 sm:$0xff]  }
 0x153   :  { %2408 = vmatprep.subr.bf16.mxu0 %v3332_v51  ;;  %2449 = vmatprep.subr.bf16.mxu1 %v3335_v52  ;;  %v3407_v50 = vld [vmem:[#allocation10 + $0x3ec] ss:$16 sps:$4 sm:$0xff]   ;;  %v3402_v51 = vld [vmem:[#allocation10 + $0x1e8] ss:$16 sps:$4 sm:$0xff]  }
 0x154   :  { %v3405_v52 = vld [vmem:[#allocation10 + $0x3e8] ss:$16 sps:$4 sm:$0xff]  }
 0x156   :  { %2409 = vmatpush2.bf16.msra.mxu0 %v3330_v53  ;;  %2450 = vmatpush2.bf16.msra.mxu1 %v3333_v54  ;;  %v3410_v53 = vld [vmem:[#allocation10 + $0x1cc] ss:$16 sps:$4 sm:$0xff]  }
 0x157   :  { %2410 = vmatprep.subr.bf16.mxu0 %v3338_v55  ;;  %2451 = vmatprep.subr.bf16.mxu1 %v3341_v56  ;;  %v3413_v54 = vld [vmem:[#allocation10 + $0x3cc] ss:$16 sps:$4 sm:$0xff]   ;;  %v3408_v55 = vld [vmem:[#allocation10 + $0x1c8] ss:$16 sps:$4 sm:$0xff]  }
 0x158   :  { %v3411_v56 = vld [vmem:[#allocation10 + $0x3c8] ss:$16 sps:$4 sm:$0xff]  }
 0x15a   :  { %2411 = vmatpush2.bf16.msra.mxu0 %v3336_v57  ;;  %2452 = vmatpush2.bf16.msra.mxu1 %v3339_v58  ;;  %v3416_v57 = vld [vmem:[#allocation10 + $0x1ac] ss:$16 sps:$4 sm:$0xff]  }
 0x15b   :  { %2412 = vmatprep.subr.bf16.mxu0 %v3344_v59  ;;  %2453 = vmatprep.subr.bf16.mxu1 %v3347_v60  ;;  %v3419_v58 = vld [vmem:[#allocation10 + $0x3ac] ss:$16 sps:$4 sm:$0xff]   ;;  %v3414_v59 = vld [vmem:[#allocation10 + $0x1a8] ss:$16 sps:$4 sm:$0xff]  }
 0x15c   :  { %v3417_v60 = vld [vmem:[#allocation10 + $0x3a8] ss:$16 sps:$4 sm:$0xff]  }
 0x15e   :  { %2413 = vmatpush2.bf16.msra.mxu0 %v3342_v62  ;;  %2454 = vmatpush2.bf16.msra.mxu1 %v3345_v0  ;;  %v3425_v62 = vld [vmem:[#allocation10 + $0x38c] ss:$16 sps:$4 sm:$0xff]   ;;  %v3423_v0 = vld [vmem:[#allocation10 + $0x388] ss:$16 sps:$4 sm:$0xff]  }
 0x15f   :  { %2414 = vmatprep.subr.bf16.mxu0 %v3350_v2  ;;  %2455 = vmatprep.subr.bf16.mxu1 %v3353_v3  ;;  %v3428_v2 = vld [vmem:[#allocation10 + $0x16c] ss:$16 sps:$4 sm:$0xff]  }
 0x160   :  { %v3431_v3 = vld [vmem:[#allocation10 + $0x36c] ss:$16 sps:$4 sm:$0xff]  }
 0x162   :  { %2415 = vmatpush2.bf16.msra.mxu0 %v3348_v5  ;;  %2456 = vmatpush2.bf16.msra.mxu1 %v3351_v7  ;;  %v3429_v5 = vld [vmem:[#allocation10 + $0x368] ss:$16 sps:$4 sm:$0xff]   ;;  %v3437_v7 = vld [vmem:[#allocation10 + $0x34c] ss:$16 sps:$4 sm:$0xff]  }
 0x163   :  { %2466 = vmatprep.subr.bf16.mxu0 %v3356_v12  ;;  %2507 = vmatprep.subr.bf16.mxu1 %v3359_v14  ;;  %v3432_v12 = vld [vmem:[#allocation10 + $0x148] ss:$16 sps:$4 sm:$0xff]  }
 0x164   :  { %v3435_v14 = vld [vmem:[#allocation10 + $0x348] ss:$16 sps:$4 sm:$0xff]  }
 0x165   :  { %2417 = vmatmul.mubr.bf16.vlgmr.msra.gmra.mxu0 %v3798_v9  ;;  %2458 = vmatmul.mubr.bf16.vlgmr.msra.gmra.mxu1 %v3796_v19 }
 0x166   :  { %2467 = vmatpush1.bf16.msra.mxu0 %v3354_v11  ;;  %2498 = vmatprep.mubr.bf16.mxu0 %v3768_v38  ;;  %v3375_v38 = vld [vmem:[#allocation10 + $0x288] ss:$16 sps:$4 sm:$0xff]   ;;  %v3440_v11 = vld [vmem:[#allocation10 + $0x12c] ss:$16 sps:$4 sm:$0xff]  }
 0x167   :  { %2508 = vmatpush1.bf16.msra.mxu1 %v3357_v20  ;;  %2539 = vmatprep.mubr.bf16.mxu1 %v3772_v42  ;;  %v3378_v42 = vld [vmem:[#allocation10 + $0x68] ss:$16 sps:$4 sm:$0xff]   ;;  %v3443_v20 = vld [vmem:[#allocation10 + $0x32c] ss:$16 sps:$4 sm:$0xff]  }
 0x168   :  { %2468 = vmatprep.subr.bf16.mxu0 %v3362_v21  ;;  %2509 = vmatprep.subr.bf16.mxu1 %v3365_v8  ;;  %v3438_v21 = vld [vmem:[#allocation10 + $0x128] ss:$16 sps:$4 sm:$0xff]  }
 0x169   :  { %v3441_v8 = vld [vmem:[#allocation10 + $0x328] ss:$16 sps:$4 sm:$0xff]  }
 0x16a   :  { %2469 = vmatpush1.bf16.msra.mxu0 %v3360_v22  ;;  %v3446_v22 = vld [vmem:[#allocation10 + $0x10c] ss:$16 sps:$4 sm:$0xff]  }
 0x16b   :  { %2510 = vmatpush1.bf16.msra.mxu1 %v3363_v23  ;;  %2470 = vmatprep.subr.bf16.mxu0 %v3368_v13  ;;  %v3449_v23 = vld [vmem:[#allocation10 + $0x30c] ss:$16 sps:$4 sm:$0xff]   ;;  %v3444_v13 = vld [vmem:[#allocation10 + $0x108] ss:$16 sps:$4 sm:$0xff]  }
 0x16c   :  { %2511 = vmatprep.subr.bf16.mxu1 %v3371_v24  ;;  %v3447_v24 = vld [vmem:[#allocation10 + $0x308] ss:$16 sps:$4 sm:$0xff]  }
 0x16e   :  { %2471 = vmatpush1.bf16.msra.mxu0 %v3366_v25  ;;  %v3452_v25 = vld [vmem:[#allocation10 + $0x4ec] ss:$16 sps:$4 sm:$0xff]  }
 0x16f   :  { %2512 = vmatpush1.bf16.msra.mxu1 %v3369_v26  ;;  %2472 = vmatprep.subr.bf16.mxu0 %v3374_v27  ;;  %v3455_v26 = vld [vmem:[#allocation10 + $0x6ec] ss:$16 sps:$4 sm:$0xff]   ;;  %v3450_v27 = vld [vmem:[#allocation10 + $0x4e8] ss:$16 sps:$4 sm:$0xff]  }
 0x170   :  { %2513 = vmatprep.subr.bf16.mxu1 %v3377_v28  ;;  %v3453_v28 = vld [vmem:[#allocation10 + $0x6e8] ss:$16 sps:$4 sm:$0xff]  }
 0x172   :  { %2473 = vmatpush1.bf16.msra.mxu0 %v3372_v29  ;;  %v3458_v29 = vld [vmem:[#allocation10 + $0x4cc] ss:$16 sps:$4 sm:$0xff]  }
 0x173   :  { %2514 = vmatpush1.bf16.msra.mxu1 %v3375_v38  ;;  %2474 = vmatprep.subr.bf16.mxu0 %v3380_v10  ;;  %v3461_v38 = vld [vmem:[#allocation10 + $0x6cc] ss:$16 sps:$4 sm:$0xff]   ;;  %v3456_v10 = vld [vmem:[#allocation10 + $0x4c8] ss:$16 sps:$4 sm:$0xff]  }
 0x174   :  { %2515 = vmatprep.subr.bf16.mxu1 %v3383_v30  ;;  %v3459_v30 = vld [vmem:[#allocation10 + $0x6c8] ss:$16 sps:$4 sm:$0xff]  }
 0x176   :  { %2475 = vmatpush1.bf16.msra.mxu0 %v3378_v42  ;;  %v3464_v42 = vld [vmem:[#allocation10 + $0x4ac] ss:$16 sps:$4 sm:$0xff]  }
 0x177   :  { %2516 = vmatpush1.bf16.msra.mxu1 %v3381_v31  ;;  %2476 = vmatprep.subr.bf16.mxu0 %v3386_v33  ;;  %v3467_v31 = vld [vmem:[#allocation10 + $0x6ac] ss:$16 sps:$4 sm:$0xff]   ;;  %v3462_v33 = vld [vmem:[#allocation10 + $0x4a8] ss:$16 sps:$4 sm:$0xff]  }
 0x178   :  { %2517 = vmatprep.subr.bf16.mxu1 %v3389_v34  ;;  %v3470_v34 = vld [vmem:[#allocation10 + $0x48c] ss:$16 sps:$4 sm:$0xff]  }
 0x17a   :  { %2477 = vmatpush1.bf16.msra.mxu0 %v3384_v35  ;;  %v3468_v35 = vld [vmem:[#allocation10 + $0x488] ss:$16 sps:$4 sm:$0xff]  }
 0x17b   :  { %2518 = vmatpush1.bf16.msra.mxu1 %v3387_v39  ;;  %2478 = vmatprep.subr.bf16.mxu0 %v3392_v40  ;;  %v3476_v39 = vld [vmem:[#allocation10 + $0x46c] ss:$16 sps:$4 sm:$0xff]  }
 0x17c   :  { %2519 = vmatprep.subr.bf16.mxu1 %v3395_v1  ;;  %v3479_v40 = vld [vmem:[#allocation10 + $0x66c] ss:$16 sps:$4 sm:$0xff]   ;;  %v3477_v1 = vld [vmem:[#allocation10 + $0x668] ss:$16 sps:$4 sm:$0xff]  }
 0x17e   :  { %2479 = vmatpush1.bf16.msra.mxu0 %v3390_v43  ;;  %v3482_v43 = vld [vmem:[#allocation10 + $0x44c] ss:$16 sps:$4 sm:$0xff]  }
 0x17f   :  { %2520 = vmatpush1.bf16.msra.mxu1 %v3393_v44  ;;  %2480 = vmatprep.subr.bf16.mxu0 %v3398_v45  ;;  %v3485_v44 = vld [vmem:[#allocation10 + $0x64c] ss:$16 sps:$4 sm:$0xff]   ;;  %v3480_v45 = vld [vmem:[#allocation10 + $0x448] ss:$16 sps:$4 sm:$0xff]  }
 0x180   :  { %2521 = vmatprep.subr.bf16.mxu1 %v3401_v46  ;;  %v3483_v46 = vld [vmem:[#allocation10 + $0x648] ss:$16 sps:$4 sm:$0xff]  }
 0x182   :  { %2481 = vmatpush1.bf16.msra.mxu0 %v3396_v47  ;;  %v3488_v47 = vld [vmem:[#allocation10 + $0x42c] ss:$16 sps:$4 sm:$0xff]  }
 0x183   :  { %2522 = vmatpush1.bf16.msra.mxu1 %v3399_v48  ;;  %2482 = vmatprep.subr.bf16.mxu0 %v3404_v49  ;;  %v3491_v48 = vld [vmem:[#allocation10 + $0x62c] ss:$16 sps:$4 sm:$0xff]   ;;  %v3486_v49 = vld [vmem:[#allocation10 + $0x428] ss:$16 sps:$4 sm:$0xff]  }
 0x184   :  { %2523 = vmatprep.subr.bf16.mxu1 %v3407_v50  ;;  %v3489_v50 = vld [vmem:[#allocation10 + $0x628] ss:$16 sps:$4 sm:$0xff]  }
 0x186   :  { %2483 = vmatpush2.bf16.msra.mxu0 %v3402_v51  ;;  %v3494_v51 = vld [vmem:[#allocation10 + $0x40c] ss:$16 sps:$4 sm:$0xff]  }
 0x187   :  { %2524 = vmatpush2.bf16.msra.mxu1 %v3405_v52  ;;  %2484 = vmatprep.subr.bf16.mxu0 %v3410_v53  ;;  %v3497_v52 = vld [vmem:[#allocation10 + $0x60c] ss:$16 sps:$4 sm:$0xff]   ;;  %v3492_v53 = vld [vmem:[#allocation10 + $0x408] ss:$16 sps:$4 sm:$0xff]  }
 0x188   :  { %2525 = vmatprep.subr.bf16.mxu1 %v3413_v54  ;;  %v3495_v54 = vld [vmem:[#allocation10 + $0x608] ss:$16 sps:$4 sm:$0xff]  }
 0x18a   :  { %2485 = vmatpush2.bf16.msra.mxu0 %v3408_v55  ;;  %v3500_v55 = vld [vmem:[#allocation10 + $0x5ec] ss:$16 sps:$4 sm:$0xff]  }
 0x18b   :  { %2526 = vmatpush2.bf16.msra.mxu1 %v3411_v56  ;;  %2486 = vmatprep.subr.bf16.mxu0 %v3416_v57  ;;  %v3503_v56 = vld [vmem:[#allocation10 + $0x7ec] ss:$16 sps:$4 sm:$0xff]   ;;  %v3498_v57 = vld [vmem:[#allocation10 + $0x5e8] ss:$16 sps:$4 sm:$0xff]  }
 0x18c   :  { %2527 = vmatprep.subr.bf16.mxu1 %v3419_v58  ;;  %v3501_v58 = vld [vmem:[#allocation10 + $0x7e8] ss:$16 sps:$4 sm:$0xff]  }
 0x18e   :  { %2487 = vmatpush2.bf16.msra.mxu0 %v3414_v59  ;;  %v3506_v59 = vld [vmem:[#allocation10 + $0x5cc] ss:$16 sps:$4 sm:$0xff]  }
 0x18f   :  { %2528 = vmatpush2.bf16.msra.mxu1 %v3417_v60  ;;  %2488 = vmatprep.subr.bf16.mxu0 %v3422_v61  ;;  %v3509_v60 = vld [vmem:[#allocation10 + $0x7cc] ss:$16 sps:$4 sm:$0xff]   ;;  %v3504_v61 = vld [vmem:[#allocation10 + $0x5c8] ss:$16 sps:$4 sm:$0xff]  }
 0x190   :  { %2529 = vmatprep.subr.bf16.mxu1 %v3425_v62  ;;  %v3507_v62 = vld [vmem:[#allocation10 + $0x7c8] ss:$16 sps:$4 sm:$0xff]  }
 0x192   :  { %2489 = vmatpush2.bf16.msra.mxu0 %v3420_v63  ;;  %v3512_v63 = vld [vmem:[#allocation10 + $0x5ac] ss:$16 sps:$4 sm:$0xff]  }
 0x193   :  { %2530 = vmatpush2.bf16.msra.mxu1 %v3423_v0  ;;  %2490 = vmatprep.subr.bf16.mxu0 %v3428_v2  ;;  %v3515_v0 = vld [vmem:[#allocation10 + $0x7ac] ss:$16 sps:$4 sm:$0xff]   ;;  %v3510_v2 = vld [vmem:[#allocation10 + $0x5a8] ss:$16 sps:$4 sm:$0xff]  }
 0x194   :  { %2531 = vmatprep.subr.bf16.mxu1 %v3431_v3  ;;  %v3513_v3 = vld [vmem:[#allocation10 + $0x7a8] ss:$16 sps:$4 sm:$0xff]  }
 0x196   :  { %2491 = vmatpush2.bf16.msra.mxu0 %v3426_v4  ;;  %v3518_v4 = vld [vmem:[#allocation10 + $0x58c] ss:$16 sps:$4 sm:$0xff]  }
 0x197   :  { %2532 = vmatpush2.bf16.msra.mxu1 %v3429_v5  ;;  %2492 = vmatprep.subr.bf16.mxu0 %v3434_v6  ;;  %v3521_v5 = vld [vmem:[#allocation10 + $0x78c] ss:$16 sps:$4 sm:$0xff]   ;;  %v3516_v6 = vld [vmem:[#allocation10 + $0x588] ss:$16 sps:$4 sm:$0xff]  }
 0x198   :  { %2533 = vmatprep.subr.bf16.mxu1 %v3437_v7  ;;  %v3519_v7 = vld [vmem:[#allocation10 + $0x788] ss:$16 sps:$4 sm:$0xff]  }
 0x19a   :  { %2493 = vmatpush2.bf16.msra.mxu0 %v3432_v12  ;;  %v3524_v12 = vld [vmem:[#allocation10 + $0x56c] ss:$16 sps:$4 sm:$0xff]  }
 0x19b   :  { %2534 = vmatpush2.bf16.msra.mxu1 %v3435_v14  ;;  %2494 = vmatprep.subr.bf16.mxu0 %v3440_v11  ;;  %v3527_v14 = vld [vmem:[#allocation10 + $0x76c] ss:$16 sps:$4 sm:$0xff]   ;;  %v3522_v11 = vld [vmem:[#allocation10 + $0x568] ss:$16 sps:$4 sm:$0xff]  }
 0x19c   :  { %2535 = vmatprep.subr.bf16.mxu1 %v3443_v20  ;;  %v3525_v20 = vld [vmem:[#allocation10 + $0x768] ss:$16 sps:$4 sm:$0xff]  }
 0x19e   :  { %2495 = vmatpush2.bf16.msra.mxu0 %v3438_v21  ;;  %v3530_v21 = vld [vmem:[#allocation10 + $0x54c] ss:$16 sps:$4 sm:$0xff]  }
 0x19f   :  { %2536 = vmatpush2.bf16.msra.mxu1 %v3441_v8  ;;  %2496 = vmatprep.subr.bf16.mxu0 %v3446_v22  ;;  %v3533_v8 = vld [vmem:[#allocation10 + $0x74c] ss:$16 sps:$4 sm:$0xff]   ;;  %v3528_v22 = vld [vmem:[#allocation10 + $0x548] ss:$16 sps:$4 sm:$0xff]  }
 0x1a0   :  { %2537 = vmatprep.subr.bf16.mxu1 %v3449_v23  ;;  %v3531_v23 = vld [vmem:[#allocation10 + $0x748] ss:$16 sps:$4 sm:$0xff]  }
 0x1a2   :  { %2497 = vmatpush2.bf16.msra.mxu0 %v3444_v13  ;;  %v3536_v13 = vld [vmem:[#allocation10 + $0x52c] ss:$16 sps:$4 sm:$0xff]  }
 0x1a3   :  { %2538 = vmatpush2.bf16.msra.mxu1 %v3447_v24  ;;  %2548 = vmatprep.subr.bf16.mxu0 %v3452_v25  ;;  %v3539_v24 = vld [vmem:[#allocation10 + $0x72c] ss:$16 sps:$4 sm:$0xff]   ;;  %v3534_v25 = vld [vmem:[#allocation10 + $0x528] ss:$16 sps:$4 sm:$0xff]  }
 0x1a4   :  { %2589 = vmatprep.subr.bf16.mxu1 %v3455_v26  ;;  %v3537_v26 = vld [vmem:[#allocation10 + $0x728] ss:$16 sps:$4 sm:$0xff]  }
 0x1a5   :  { %2499 = vmatmul.mubr.bf16.vlgmr.msra.gmra.mxu0 %v3770_v41  ;;  %v3465_v41 = vld [vmem:[#allocation10 + $0x6a8] ss:$16 sps:$4 sm:$0xff]  }
 0x1a6   :  { %2540 = vmatmul.mubr.bf16.vlgmr.msra.gmra.mxu1 %v3766_v37  ;;  %2549 = vmatpush1.bf16.msra.mxu0 %v3450_v27  ;;  %v3473_v37 = vld [vmem:[#allocation10 + $0x68c] ss:$16 sps:$4 sm:$0xff]  }
 0x1a7   :  { %2580 = vmatprep.mubr.bf16.mxu0 %v3786_v32  ;;  %2590 = vmatpush1.bf16.msra.mxu1 %v3453_v28  ;;  %v3471_v32 = vld [vmem:[#allocation10 + $0x688] ss:$16 sps:$4 sm:$0xff]   ;;  %v3542_v27 = vld [vmem:[#allocation10 + $0x50c] ss:$16 sps:$4 sm:$0xff]  }
 0x1a8   :  { %2621 = vmatprep.mubr.bf16.mxu1 %v3788_v36  ;;  %2550 = vmatprep.subr.bf16.mxu0 %v3458_v29  ;;  %v3474_v36 = vld [vmem:[#allocation10 + $0x468] ss:$16 sps:$4 sm:$0xff]   ;;  %v3545_v28 = vld [vmem:[#allocation10 + $0x70c] ss:$16 sps:$4 sm:$0xff]  }
 0x1a9   :  { %2591 = vmatprep.subr.bf16.mxu1 %v3461_v38  ;;  %v3540_v29 = vld [vmem:[#allocation10 + $0x508] ss:$16 sps:$4 sm:$0xff]  }
 0x1aa   :  { %2551 = vmatpush1.bf16.msra.mxu0 %v3456_v10  ;;  %v3543_v38 = vld [vmem:[#allocation10 + $0x708] ss:$16 sps:$4 sm:$0xff]  }
 0x1ab   :  { %2592 = vmatpush1.bf16.msra.mxu1 %v3459_v30  ;;  %2552 = vmatprep.subr.bf16.mxu0 %v3464_v42 }
 0x1ac   :  { %2593 = vmatprep.subr.bf16.mxu1 %v3467_v31 }
 0x1ae   :  { %2553 = vmatpush1.bf16.msra.mxu0 %v3462_v33 }
 0x1af   :  { %2594 = vmatpush1.bf16.msra.mxu1 %v3465_v41  ;;  %2554 = vmatprep.subr.bf16.mxu0 %v3470_v34 }
 0x1b0   :  { %2595 = vmatprep.subr.bf16.mxu1 %v3473_v37 }
 0x1b2   :  { %2555 = vmatpush1.bf16.msra.mxu0 %v3468_v35  ;;  %v1000_v35 = vld [vmem:[%s3832_s4] sm:$0xf] }
 0x1b3   :  { %2596 = vmatpush1.bf16.msra.mxu1 %v3471_v32  ;;  %2556 = vmatprep.subr.bf16.mxu0 %v3476_v39  ;;  %v1005_v32 = vrot.slane %v1000_v35, %v3747_v15  ;;  %v1009_v39 = vrot.slane %v1000_v35, %v3753_v17 }
 0x1b4   :  { %2597 = vmatprep.subr.bf16.mxu1 %v3479_v40 }
 0x1b6   :  { %2557 = vmatpush1.bf16.msra.mxu0 %v3474_v36 }
 0x1b7   :  { %2598 = vmatpush1.bf16.msra.mxu1 %v3477_v1  ;;  %2558 = vmatprep.subr.bf16.mxu0 %v3482_v43 }
 0x1b8   :  { %2599 = vmatprep.subr.bf16.mxu1 %v3485_v44 }
 0x1ba   :  { %2559 = vmatpush1.bf16.msra.mxu0 %v3480_v45 }
 0x1bb   :  { %2600 = vmatpush1.bf16.msra.mxu1 %v3483_v46  ;;  %2560 = vmatprep.subr.bf16.mxu0 %v3488_v47 }
 0x1bc   :  { %2601 = vmatprep.subr.bf16.mxu1 %v3491_v48 }
 0x1be   :  { %2561 = vmatpush1.bf16.msra.mxu0 %v3486_v49 }
 0x1bf   :  { %2602 = vmatpush1.bf16.msra.mxu1 %v3489_v50  ;;  %2562 = vmatprep.subr.bf16.mxu0 %v3494_v51 }
 0x1c0   :  { %2603 = vmatprep.subr.bf16.mxu1 %v3497_v52 }
 0x1c2   :  { %2563 = vmatpush1.bf16.msra.mxu0 %v3492_v53 }
 0x1c3   :  { %2604 = vmatpush1.bf16.msra.mxu1 %v3495_v54  ;;  %2564 = vmatprep.subr.bf16.mxu0 %v3500_v55  ;;  %v2634_v55 = vld [vmem:[%s3833_s5] sm:$0xf]  ;;  %s3667_s5 = smov [#allocation12]  }
 0x1c4   :  { %2605 = vmatprep.subr.bf16.mxu1 %v3503_v56  ;;  %s2820_s25 = sshll.u32 %s3667_s5, 4  ;;  %s2821_s25 = int_to_ptr.vmem [resolvable:$true] %s2820_s25 }
 0x1c5   :  { %s3630_s26 = scalar_lea.vmem %s2821_s25, 16  ;;  %s3634_s27 = scalar_lea.vmem %s2821_s25, 32 }
 0x1c6   :  { %2565 = vmatpush2.bf16.msra.mxu0 %v3498_v57  ;;  %v2653_v57 = vrot.slane %v2634_v55, %v3753_v17  ;;  %v1013_v17 = vrot.slane %v1000_v35, %v3750_v16  ;;  %p3631_p6 = scmp.ne.s32.totalorder %s2821_s25, %s3630_s26  ;;  %p3635_p7 = scmp.lt.s32.totalorder %s2821_s25, %s2821_s25 }
 0x1c7   :  { %2606 = vmatpush2.bf16.msra.mxu1 %v3501_v58  ;;  %2566 = vmatprep.subr.bf16.mxu0 %v3506_v59  ;;  %v2649_v58 = vrot.slane %v2634_v55, %v3747_v15  ;;  %v2661_v59 = vrot.slane %v2634_v55, %v3756_v18  ;;  %p3636_p8 = scmp.lt.s32.totalorder %s3634_s27, %s3630_s26 }
 0x1c8   :  { %2607 = vmatprep.subr.bf16.mxu1 %v3509_v60  ;;  %v2635_v60 = vld [vmem:[#allocation3] sm:$0x1] }
 0x1c9   :  { %2638 = vperm.xlu0 %3161, %v2635_v60   ;;  %p3637_p9 = por %p3636_p8, %p3635_p7 }
 0x1ca   :  { %2567 = vmatpush2.bf16.msra.mxu0 %v3504_v61 }
 0x1cb   :  { %2608 = vmatpush2.bf16.msra.mxu1 %v3507_v62  ;;  %2568 = vmatprep.subr.bf16.mxu0 %v3512_v63  ;;  %p3638_p10 = pnand %p3637_p9, %p3631_p6 }
 0x1cc   :  { %2609 = vmatprep.subr.bf16.mxu1 %v3515_v0 }
 0x1ce   :  { %2569 = vmatpush2.bf16.msra.mxu0 %v3510_v2 }
 0x1cf   :  { %2610 = vmatpush2.bf16.msra.mxu1 %v3513_v3  ;;  %2570 = vmatprep.subr.bf16.mxu0 %v3518_v4 }
 0x1d0   :  { %2611 = vmatprep.subr.bf16.mxu1 %v3521_v5 }
 0x1d2   :  { %2571 = vmatpush2.bf16.msra.mxu0 %v3516_v6  ;;  %v1017_v6 = vrot.slane %v1000_v35, %v3756_v18  ;;  %v2657_v18 = vrot.slane %v2634_v55, %v3750_v16 }
 0x1d3   :  { %2612 = vmatpush2.bf16.msra.mxu1 %v3519_v7  ;;  %2572 = vmatprep.subr.bf16.mxu0 %v3524_v12 }
 0x1d4   :  { %2613 = vmatprep.subr.bf16.mxu1 %v3527_v14 }
 0x1d6   :  { %2573 = vmatpush2.bf16.msra.mxu0 %v3522_v11 }
 0x1d7   :  { %2614 = vmatpush2.bf16.msra.mxu1 %v3525_v20  ;;  %2574 = vmatprep.subr.bf16.mxu0 %v3530_v21 }
 0x1d8   :  { %2615 = vmatprep.subr.bf16.mxu1 %v3533_v8 }
 0x1da   :  { %2575 = vmatpush2.bf16.msra.mxu0 %v3528_v22 }
 0x1db   :  { %2616 = vmatpush2.bf16.msra.mxu1 %v3531_v23  ;;  %2576 = vmatprep.subr.bf16.mxu0 %v3536_v13 }
 0x1dc   :  { %2617 = vmatprep.subr.bf16.mxu1 %v3539_v24 }
 0x1de   :  { %2577 = vmatpush2.bf16.msra.mxu0 %v3534_v25 }
 0x1df   :  { %2618 = vmatpush2.bf16.msra.mxu1 %v3537_v26  ;;  %2578 = vmatprep.subr.bf16.mxu0 %v3542_v27 }
 0x1e0   :  { %2619 = vmatprep.subr.bf16.mxu1 %v3545_v28 }
 0x1e2   :  { %2579 = vmatpush2.bf16.msra.mxu0 %v3540_v29 }
 0x1e3   :  { %2620 = vmatpush2.bf16.msra.mxu1 %v3543_v38 }
 0x1e5   :  { %2581 = vmatmul.mubr.bf16.vlgmr.msra.gmra.mxu0 %v3798_v9  ;;  %v2336_v10 = vpop.f32.mrf.mxu0  ;;  %v2377_v30 = vpop.f32.mrf.mxu1 }
 0x1e6   :  { %2622 = vmatmul.mubr.bf16.vlgmr.msra.gmra.mxu1 %v3796_v19  ;;  %v2337_v40 = vadd.f32 %v2336_v10, %v1005_v32  ;;  %2730 = vmatprep.mubr.f32.mxu0 %v2653_v57 }
 0x1e7   :  { %v2338_v42 = vpop.f32.mrf.mxu0  ;;  %v2379_v31 = vpop.f32.mrf.mxu1  ;;  %2800 = vmatprep.mubr.f32.mxu1 %v2661_v59 }
 0x1e8   :  { %v2339_v9 = vadd.f32 %v2338_v42, %v1009_v39  ;;  %v2378_v36 = vadd.f32 %v2377_v30, %v2337_v40 }
 0x1e9   :  { %v2340_v33 = vpop.f32.mrf.mxu0  ;;  %v2381_v41 = vpop.f32.mrf.mxu1 }
 0x1ea   :  { %v2380_v19 = vadd.f32 %v2379_v31, %v2339_v9 }
 0x1eb   :  { %v2341_v34 = vpop.f32.mrf.mxu0  ;;  %v2382_v37 = vpop.f32.mrf.mxu1 }
 0x225   :  { %v2418_v1 = vpop.f32.mrf.mxu0  ;;  %v2459_v44 = vpop.f32.mrf.mxu1 }
 0x226   :  { %v2419_v43 = vadd.f32 %v2418_v1, %v2378_v36 }
 0x227   :  { %v2420_v45 = vpop.f32.mrf.mxu0  ;;  %v2461_v47 = vpop.f32.mrf.mxu1 }
 0x228   :  { %v2421_v46 = vadd.f32 %v2420_v45, %v2380_v19  ;;  %v2460_v48 = vadd.f32 %v2459_v44, %v2419_v43 }
 0x229   :  { %v2422_v49 = vpop.f32.mrf.mxu0  ;;  %v2463_v51 = vpop.f32.mrf.mxu1 }
 0x22a   :  { %v2462_v50 = vadd.f32 %v2461_v47, %v2421_v46  ;;  %v2630_v56 = vmax.f32 %v2460_v48, 0.0 }
 0x22b   :  { %v2423_v52 = vpop.f32.mrf.mxu0  ;;  %v2464_v54 = vpop.f32.mrf.mxu1 }
 0x22c   :  { %v2631_v53 = vmax.f32 %v2462_v50, 0.0 }
 0x22e   :  { %2696 = vmatprep.subr.mxu0 %v2631_v53 }
 0x22f   :  { %2697 = vmatpush1.xpose.msra.mxu0 %v2630_v56 }
 0x232   :  { %2731 = vmatmul.mubr.f32.vlgmr.msra.gmra.mxu0 %v2649_v58 }
 0x244   :  { %v2639_v31 = vpop.permute.xlu0 %2638 }
 0x245   :  { %v2644_v33 = vrot.slane %v2639_v31, %v3747_v15 }
 0x265   :  { %v2500_v61 = vpop.f32.mrf.mxu0 }
 0x266   :  { %v2541_v62 = vpop.f32.mrf.mxu1  ;;  %v2501_v7 = vadd.f32 %v2500_v61, %v1013_v17 }
 0x267   :  { %v2502_v63 = vpop.f32.mrf.mxu0 }
 0x268   :  { %v2543_v0 = vpop.f32.mrf.mxu1  ;;  %v2503_v12 = vadd.f32 %v2502_v63, %v1017_v6  ;;  %v2542_v14 = vadd.f32 %v2541_v62, %v2501_v7 }
 0x269   :  { %v2504_v2 = vpop.f32.mrf.mxu0 }
 0x26a   :  { %v2545_v3 = vpop.f32.mrf.mxu1  ;;  %v2544_v20 = vadd.f32 %v2543_v0, %v2503_v12 }
 0x26b   :  { %v2505_v4 = vpop.f32.mrf.mxu0 }
 0x26c   :  { %v2546_v5 = vpop.f32.mrf.mxu1 }
 0x2a5   :  { %v2582_v11 = vpop.f32.mrf.mxu0 }
 0x2a6   :  { %v2583_v21 = vadd.f32 %v2582_v11, %v2542_v14  ;;  %v2623_v8 = vpop.f32.mrf.mxu1 }
 0x2a7   :  { %v2584_v22 = vpop.f32.mrf.mxu0 }
 0x2a8   :  { %v2585_v23 = vadd.f32 %v2584_v22, %v2544_v20  ;;  %v2625_v13 = vpop.f32.mrf.mxu1  ;;  %v2624_v24 = vadd.f32 %v2623_v8, %v2583_v21 }
 0x2a9   :  { %v2586_v25 = vpop.f32.mrf.mxu0 }
 0x2aa   :  { %v2626_v26 = vadd.f32 %v2625_v13, %v2585_v23  ;;  %v2627_v27 = vpop.f32.mrf.mxu1  ;;  %v2632_v10 = vmax.f32 %v2624_v24, 0.0 }
 0x2ab   :  { %v2587_v28 = vpop.f32.mrf.mxu0 }
 0x2ac   :  { %v2633_v29 = vmax.f32 %v2626_v26, 0.0  ;;  %v2628_v38 = vpop.f32.mrf.mxu1 }
 0x2ae   :  { %2766 = vmatprep.subr.mxu1 %v2633_v29 }
 0x2af   :  { %2767 = vmatpush1.xpose.msra.mxu1 %v2632_v10 }
 0x2b2   :  { %2801 = vmatmul.mubr.f32.vlgmr.msra.gmra.mxu1 %v2657_v18 }
 0x2f2   :  { %v2732_v30 = vpop.f32.mrf.mxu0 }
 0x2f3   :  { %v2733_v41 = vadd.f32 %v2732_v30, %v2644_v33 }
 0x2f4   :  { %v2734_v42 = vpop.f32.mrf.mxu0 }
 0x372   :  { %v2802_v34 = vpop.f32.mrf.mxu1 }
 0x373   :  { %v2803_v37 = vadd.f32 %v2802_v34, %v2733_v41 }
 0x374   :  { %v2804_v35 = vpop.f32.mrf.mxu1 }
 0x375   :  { %v2806_v32 = vsub.f32 0.0, %v2803_v37 }
 0x377   :  { %v2807_v39 = vmul.f32 1.442695, %v2806_v32 }
 0x379   :  { %3546 = vpow2.f32 %v2807_v39 }
 0x386   :  { %v3547_v40 = vpop.eup %3546 }
 0x387   :  { %v2809_v9 = vadd.f32 1.0, %v3547_v40 }
 0x389   :  { %3548 = vrcp.f32 %v2809_v9 }
 0x396   :  { %v3549_v16 = vpop.eup %3548 }
 0x397   :  { %2813 = vst.msk [vmem:[#allocation12] sm:$0x1] %vm2812_vm0, %v3549_v16 }
 0x398   :  { %3641 = shalt.err (!%p3638_p10)
}
 0x399   :  { %2823 = dma.vmem_to_hbm [thread:$0]  %s2821_s25, 16, %s3835_s7, [#allocation6]  }
 0x39a   :  { %3656 = dma.done.wait [#allocation6], 16  }
 0x39b   :  { %3657 = vsyncadd [#allocation6], 4294967280 }
 0x39c   :  { %2827 = vsyncpa [#allocation5], 1 }
 0x39d   :  { %2828 = vsyncpa [#allocation8], 1 }
 0x39e   :  { %2829 = vsyncpa [#allocation11], 1 }
 0x39f   :  { %2830 = vsyncpa [#allocation6], 1 }

</bundles_post_ra>
